<compile_context>
chip_gen: v5e
topology: v5e:2x2
jax: 0.10.0
libtpu: 0.0.40
codegen_flags: <defaults>
</compile_context>

<pallas_src>
import functools

import jax
import jax.numpy as jnp
from jax.experimental import pallas as pl
from jax.experimental.pallas import tpu as pltpu

f32 = jnp.float32
bf16 = jnp.bfloat16


def memory_network_kernel(
    # ---- data ----
    hq_ref, mem0_ref, ssrc_ref, adst_ref, hasin_ref, relmsg_ref,
    # ---- initial query embedding (W_query) ----
    wq_ref, qbias_ref,
    # ---- MemoryRead (W_att, U_att, w_att, W_cat stacked) ----
    watt_ref, uatt_ref, attb_ref, wv_ref, krep_ref, wcat_ref, catb_ref,
    # ---- MemoryWrite (W_query / W_mem / W_msg pre-folded through W_all) ----
    wqall_ref, wqall0_ref, wmemall_ref, wmsgall_ref, allb_ref,
    # ---- output ----
    out_ref,
    *, T,
):
    def mmb(a_bf, w_ref):
        # bf16 MXU matmul with f32 accumulation; weight loaded at its point of use.
        return jnp.dot(a_bf, w_ref[...], preferred_element_type=f32)

    def mmf(a, b):
        # f32 structural matmul (0/1 matrix): keeps carried state at f32 precision.
        return jnp.dot(a, b, preferred_element_type=f32)

    # ========================= MemoryRead =========================
    def memory_read(h, mem2):
        h_bf = h.astype(bf16)            # cast hoisted: reused for W_att and W_cat
        mem2_bf = mem2.astype(bf16)
        att_in = jnp.tanh(mmb(h_bf, watt_ref) + mmb(mem2_bf, uatt_ref) + attb_ref[...])
        # w_att's bias is a constant shift of the scores -> softmax-invariant, dropped.
        scores = mmb(att_in.astype(bf16), wv_ref)              # [M, N]
        smax = jnp.max(scores, axis=0, keepdims=True)          # [1, N]
        p = jnp.exp(scores - smax)                             # [M, N]
        att = p / jnp.sum(p, axis=0, keepdims=True)            # exact softmax over nodes
        att_e = mmf(att, krep_ref[...])                        # [M, N*Dm] f32 per-block repeat
        ctx = jnp.sum(att_e * mem2, axis=0, keepdims=True)     # [1, N*Dm] context per query
        # W_cat([ctx ; h]) as ONE stacked matmul (lane concat at a 128-aligned boundary).
        cat = jnp.concatenate([ctx.astype(bf16), h_bf], axis=1)       # [1, N*(Dm+QH)]
        return jax.nn.relu(mmb(cat, wcat_ref) + catb_ref[...])        # [1, N*QH]

    # ========================= MemoryWrite =========================
    # W_query/W_mem/W_msg are already folded through W_all, so the step is:
    #   new = relu(q @ Wq' + mem @ Wm' + A_dst @ (S_src @ mem @ Wmsg' + relmsg') + b')
    def memory_write(h, mem2, wq_weight_ref):
        h_bf = h.astype(bf16)
        mem2_bf = mem2.astype(bf16)
        src = jnp.dot(ssrc_ref[...], mem2_bf, preferred_element_type=f32)   # [E, N*Dm] gather
        msg = mmb(src.astype(bf16), wmsgall_ref) + relmsg_ref[...]          # [E, N*Dm]
        nbr = mmf(adst_ref[...], msg)                                       # [M, N*Dm] scatter-add (f32)
        new = jax.nn.relu(mmb(h_bf, wq_weight_ref)          # [1, N*Dm] query term (broadcast)
                          + mmb(mem2_bf, wmemall_ref)       # [M, N*Dm] memory term
                          + nbr + allb_ref[...])
        # DGL update_all leaves zero-in-degree nodes untouched.
        return jnp.where(hasin_ref[...] > 0.5, new, mem2)

    # ---- initial query embedding: h = relu(W_query([h_q ; question])) ----
    # (the question term is identical per node -> precomputed bias row)
    h = jax.nn.relu(mmb(hq_ref[...].astype(bf16), wq_ref) + qbias_ref[...])   # [1, N*QH]
    mem2 = mem0_ref[...]                                                      # [M, N*Dm]

    if T >= 1:
        # t = 0 read.
        h = memory_read(h, mem2)
        if T >= 2:
            # t = 0 write: the reference aliases ONE memory graph across all N copies,
            # so every copy sees q = h[N-1]; wqall0 encodes that directly.
            mem2 = memory_write(h, mem2, wqall0_ref)

            def step(carry):
                h, mem2 = carry
                h = memory_read(h, mem2)
                return h, memory_write(h, mem2, wqall_ref)

            n_mid = T - 2                        # steps t = 1 .. T-2 do read + write
            if n_mid > 0:
                if n_mid <= 3:                   # short trip counts: keep unrolled
                    for _ in range(n_mid):
                        h, mem2 = step((h, mem2))
                else:                            # large T: bounded live ranges
                    h, mem2 = jax.lax.fori_loop(0, n_mid, lambda t, c: step(c), (h, mem2))

            # Final step t = T-1: its write does not affect the returned query state.
            h = memory_read(h, mem2)

    out_ref[...] = h                             # [1, N*QH] lane-dense store


def memory_network_forward(params, hq, question, hm, rel, src_idx, dst_idx, T):
    N, Dq = hq.shape
    M, Dm = hm.shape
    E, _ = rel.shape
    QH = params["wq_w"].shape[1]
    H = params["wqw_w"].shape[1]

    def blk(w):      # block-diagonal kron(I_N, w): one copy of w per query lane block
        return jnp.kron(jnp.eye(N, dtype=f32), w.astype(f32))

    def tile_b(b):   # tile a [1, C] bias row across the N lane blocks
        return jnp.tile(b.astype(f32).reshape(1, -1), (1, N))

    # Graph as dense {0,1} matrices, shared across the query batch.
    ssrc = jax.nn.one_hot(src_idx, M, dtype=f32)                       # [E, M]
    adst = jax.nn.one_hot(dst_idx, M, dtype=f32).T                     # [M, E]
    has_in = (jnp.sum(adst, axis=1, keepdims=True) > 0).astype(f32)    # [M, 1]

    # Lane-packed data.
    hq_flat = hq.reshape(1, N * Dq).astype(f32)                        # [1, N*Dq]
    mem2_init = jnp.tile(hm.astype(f32), (1, N))                       # [M, N*Dm]

    # W_query split: the question part is identical for every node -> a bias row.
    wq_a = params["wq_w"][:Dq, :]
    q_bias = question[None, :] @ params["wq_w"][Dq:, :] + params["wq_b"]       # [1, QH]

    # Fold MemoryWrite's W_query / W_mem / W_msg linears through W_all (all linear, no
    # nonlinearity in between): fewer per-step matmuls, all Dm-wide on the lane axis.
    wall = params["wall_w"]
    A1, A2, A3 = wall[:H, :], wall[H:2 * H, :], wall[2 * H:, :]
    wq_all = params["wqw_w"] @ A1                                              # [QH, Dm]
    wmem_all = params["wmem_w"] @ A2                                           # [Dm, Dm]
    wmsg_all = params["wmsg_w"][:Dm, :] @ A3                                   # [Dm, Dm]
    rel_msg = (rel @ params["wmsg_w"][Dm:, :] + params["wmsg_b"]) @ A3         # [E, Dm]
    all_bias = params["wall_b"] + params["wqw_b"] @ A1 + params["wmem_b"] @ A2  # [1, Dm]

    # t==0 query-term weight: only the last query block's rows are nonzero and they are
    # tiled across all N output blocks, so h @ wq_all_t0 == (q = h[N-1]) for every copy.
    wq_all_t0 = jnp.concatenate(
        [jnp.zeros(((N - 1) * QH, N * Dm), f32), jnp.tile(wq_all, (1, N))], axis=0)

    # W_cat's two contraction halves stacked -> one matmul for [ctx ; h].
    wcat_stack = jnp.concatenate([blk(params["wcat_w"][:Dm, :]),
                                  blk(params["wcat_w"][Dm:, :])], axis=0)      # [N*(Dm+QH), N*QH]

    # Per-block attention repeat matrix (f32, structural -> exact).
    krep = jnp.kron(jnp.eye(N, dtype=f32), jnp.ones((1, Dm), f32))             # [N, N*Dm]

    args = (
        hq_flat, mem2_init, ssrc.astype(bf16), adst, has_in,
        jnp.tile(rel_msg, (1, N)),
        blk(wq_a).astype(bf16), tile_b(q_bias),
        blk(params["watt_w"]).astype(bf16), blk(params["uatt_w"]).astype(bf16),
        tile_b(params["watt_b"] + params["uatt_b"]),
        blk(params["wv_w"]).astype(bf16), krep,
        wcat_stack.astype(bf16), tile_b(params["wcat_b"]),
        blk(wq_all).astype(bf16), wq_all_t0.astype(bf16),
        blk(wmem_all).astype(bf16), blk(wmsg_all).astype(bf16),
        tile_b(all_bias),
    )

    # Scoped-VMEM request derived from the real argument footprint (+ headroom),
    # never the whole physical VMEM of a v7x TensorCore.
    arg_bytes = sum(int(a.size) * a.dtype.itemsize for a in args)
    vmem_limit = int(min(arg_bytes * 3 + (4 << 20), 48 << 20))

    vmem = pl.BlockSpec(memory_space=pltpu.MemorySpace.VMEM)
    kernel = functools.partial(memory_network_kernel, T=T)
    h_flat = pl.pallas_call(
        kernel,
        out_shape=jax.ShapeDtypeStruct((1, N * QH), f32),
        in_specs=[vmem] * len(args),
        out_specs=vmem,
        compiler_params=pltpu.CompilerParams(vmem_limit_bytes=vmem_limit),
    )(*args)
    return h_flat.reshape(N, QH)


def init_params(key, query_input_size, memory_size, que_size, query_hidden,
                relation_size, memory_hidden, att_proj):
    def lin(k, fan_in, fan_out):
        kw, kb = jax.random.split(k)
        w = jax.random.normal(kw, (fan_in, fan_out), jnp.float32) * 0.1
        b = jax.random.normal(kb, (1, fan_out), jnp.float32) * 0.1
        return w, b

    keys = jax.random.split(key, 9)
    p = {}
    p["wq_w"], p["wq_b"] = lin(keys[0], query_input_size + que_size, query_hidden)
    p["watt_w"], p["watt_b"] = lin(keys[1], query_hidden, att_proj)
    p["uatt_w"], p["uatt_b"] = lin(keys[2], memory_size, att_proj)
    p["wv_w"], p["wv_b"] = lin(keys[3], att_proj, 1)
    p["wcat_w"], p["wcat_b"] = lin(keys[4], memory_size + query_hidden, query_hidden)
    p["wmsg_w"], p["wmsg_b"] = lin(keys[5], memory_size + relation_size, memory_hidden)
    p["wmem_w"], p["wmem_b"] = lin(keys[6], memory_size, memory_hidden)
    p["wqw_w"], p["wqw_b"] = lin(keys[7], query_hidden, memory_hidden)
    p["wall_w"], p["wall_b"] = lin(keys[8], 3 * memory_hidden, memory_size)
    return p


if __name__ == "__main__":
    key = jax.random.PRNGKey(0)
    k_param, k_hq, k_q, k_hm, k_rel = jax.random.split(key, 5)

    # Module hyper-parameters (small synthetic sizes)
    N, M = 8, 8                 # query nodes / memory-graph nodes
    query_input_size = 16
    que_size = 8
    query_hidden = 32
    memory_size = 16
    relation_size = 8
    memory_hidden = 32
    att_proj = 16
    T = 2

    # Bidirectional ring memory graph (every node has in-degree 2, so the dense
    # scatter matches DGL update_all exactly).
    src_idx = jnp.array(list(range(M)) + list(range(M)), dtype=jnp.int32)
    dst_idx = jnp.array([(i + 1) % M for i in range(M)]
                        + [(i - 1) % M for i in range(M)], dtype=jnp.int32)
    E = int(src_idx.shape[0])

    params = init_params(k_param, query_input_size, memory_size, que_size,
                         query_hidden, relation_size, memory_hidden, att_proj)

    hq = jax.random.normal(k_hq, (N, query_input_size), jnp.float32)      # query ndata['h']
    question = jax.random.normal(k_q, (que_size,), jnp.float32)           # question vector
    hm = jax.random.normal(k_hm, (M, memory_size), jnp.float32)           # memory ndata['h']
    rel = jax.random.normal(k_rel, (E, relation_size), jnp.float32)       # memory edata['rel']

    out = memory_network_forward(params, hq, question, hm, rel, src_idx, dst_idx, T)
    out = jax.block_until_ready(out)
    assert out.shape == (N, query_hidden) and out.dtype == jnp.float32
    print("KERNEL_OK")
</pallas_src>

<mosaic_0001>
module attributes {stable_mosaic.version = 11 : i64} {
  func.func @memory_network_kernel(%arg0: memref<1x128xf32, #tpu.memory_space<vmem>>, %arg1: memref<8x128xf32, #tpu.memory_space<vmem>>, %arg2: memref<16x8xbf16, #tpu.memory_space<vmem>>, %arg3: memref<8x16xf32, #tpu.memory_space<vmem>>, %arg4: memref<8x1xf32, #tpu.memory_space<vmem>>, %arg5: memref<16x128xf32, #tpu.memory_space<vmem>>, %arg6: memref<128x256xbf16, #tpu.memory_space<vmem>>, %arg7: memref<1x256xf32, #tpu.memory_space<vmem>>, %arg8: memref<256x128xbf16, #tpu.memory_space<vmem>>, %arg9: memref<128x128xbf16, #tpu.memory_space<vmem>>, %arg10: memref<1x128xf32, #tpu.memory_space<vmem>>, %arg11: memref<128x8xbf16, #tpu.memory_space<vmem>>, %arg12: memref<8x128xf32, #tpu.memory_space<vmem>>, %arg13: memref<384x256xbf16, #tpu.memory_space<vmem>>, %arg14: memref<1x256xf32, #tpu.memory_space<vmem>>, %arg15: memref<256x128xbf16, #tpu.memory_space<vmem>>, %arg16: memref<256x128xbf16, #tpu.memory_space<vmem>>, %arg17: memref<128x128xbf16, #tpu.memory_space<vmem>>, %arg18: memref<128x128xbf16, #tpu.memory_space<vmem>>, %arg19: memref<1x128xf32, #tpu.memory_space<vmem>>, %arg20: memref<1x256xf32, #tpu.memory_space<vmem>>) attributes {dimension_semantics = [], scalar_prefetch = 0 : i64, scratch_operands = 0 : i64, tpu.core_type = #tpu.core_type<tc>} {
    %c0 = arith.constant 0 : index
    %c0_0 = arith.constant 0 : index
    %0 = vector.load %arg0[%c0, %c0_0] : memref<1x128xf32, #tpu.memory_space<vmem>>, vector<1x128xf32>
    %1 = arith.truncf %0 : vector<1x128xf32> to vector<1x128xbf16>
    %c0_1 = arith.constant 0 : index
    %c0_2 = arith.constant 0 : index
    %2 = vector.load %arg6[%c0_1, %c0_2] : memref<128x256xbf16, #tpu.memory_space<vmem>>, vector<128x256xbf16>
    %cst = arith.constant dense<0.000000e+00> : vector<1x256xf32>
    %3 = tpu.matmul %1, %2, %cst {dimension_numbers = #tpu.dot_dimension_numbers<[1], [0], [0], [1], [0, 0, 1, 1], [], []>} : vector<1x128xbf16>, vector<128x256xbf16>, vector<1x256xf32> -> vector<1x256xf32>
    %c0_3 = arith.constant 0 : index
    %c0_4 = arith.constant 0 : index
    %4 = vector.load %arg7[%c0_3, %c0_4] : memref<1x256xf32, #tpu.memory_space<vmem>>, vector<1x256xf32>
    %5 = arith.addf %3, %4 : vector<1x256xf32>
    %cst_5 = arith.constant 0.000000e+00 : f32
    %6 = vector.broadcast %cst_5 : f32 to vector<1x256xf32>
    %7 = arith.maximumf %5, %6 : vector<1x256xf32>
    %c0_6 = arith.constant 0 : index
    %c0_7 = arith.constant 0 : index
    %8 = vector.load %arg1[%c0_6, %c0_7] : memref<8x128xf32, #tpu.memory_space<vmem>>, vector<8x128xf32>
    %9 = arith.truncf %7 : vector<1x256xf32> to vector<1x256xbf16>
    %10 = arith.truncf %8 : vector<8x128xf32> to vector<8x128xbf16>
    %c0_8 = arith.constant 0 : index
    %c0_9 = arith.constant 0 : index
    %11 = vector.load %arg8[%c0_8, %c0_9] : memref<256x128xbf16, #tpu.memory_space<vmem>>, vector<256x128xbf16>
    %cst_10 = arith.constant dense<0.000000e+00> : vector<1x128xf32>
    %12 = tpu.matmul %9, %11, %cst_10 {dimension_numbers = #tpu.dot_dimension_numbers<[1], [0], [0], [1], [0, 0, 1, 1], [], []>} : vector<1x256xbf16>, vector<256x128xbf16>, vector<1x128xf32> -> vector<1x128xf32>
    %c0_11 = arith.constant 0 : index
    %c0_12 = arith.constant 0 : index
    %13 = vector.load %arg9[%c0_11, %c0_12] : memref<128x128xbf16, #tpu.memory_space<vmem>>, vector<128x128xbf16>
    %cst_13 = arith.constant dense<0.000000e+00> : vector<8x128xf32>
    %14 = tpu.matmul %10, %13, %cst_13 {dimension_numbers = #tpu.dot_dimension_numbers<[1], [0], [0], [1], [0, 0, 1, 1], [], []>} : vector<8x128xbf16>, vector<128x128xbf16>, vector<8x128xf32> -> vector<8x128xf32>
    %15 = vector.broadcast %12 : vector<1x128xf32> to vector<8x128xf32>
    %16 = arith.addf %15, %14 : vector<8x128xf32>
    %c0_14 = arith.constant 0 : index
    %c0_15 = arith.constant 0 : index
    %17 = vector.load %arg10[%c0_14, %c0_15] : memref<1x128xf32, #tpu.memory_space<vmem>>, vector<1x128xf32>
    %18 = vector.broadcast %17 : vector<1x128xf32> to vector<8x128xf32>
    %19 = arith.addf %16, %18 : vector<8x128xf32>
    %20 = math.tanh %19 : vector<8x128xf32>
    %21 = arith.truncf %20 : vector<8x128xf32> to vector<8x128xbf16>
    %c0_16 = arith.constant 0 : index
    %c0_17 = arith.constant 0 : index
    %22 = vector.load %arg11[%c0_16, %c0_17] : memref<128x8xbf16, #tpu.memory_space<vmem>>, vector<128x8xbf16>
    %cst_18 = arith.constant dense<0.000000e+00> : vector<8x8xf32>
    %23 = tpu.matmul %21, %22, %cst_18 {dimension_numbers = #tpu.dot_dimension_numbers<[1], [0], [0], [1], [0, 0, 1, 1], [], []>} : vector<8x128xbf16>, vector<128x8xbf16>, vector<8x8xf32> -> vector<8x8xf32>
    %cst_19 = arith.constant dense<0xFF800000> : vector<8xf32>
    %24 = vector.multi_reduction <maximumf>, %23, %cst_19 [0] : vector<8x8xf32> to vector<8xf32>
    %25 = vector.shape_cast %24 : vector<8xf32> to vector<1x8xf32>
    %26 = vector.broadcast %25 : vector<1x8xf32> to vector<8x8xf32>
    %27 = arith.subf %23, %26 : vector<8x8xf32>
    %28 = math.exp %27 : vector<8x8xf32>
    %cst_20 = arith.constant dense<0.000000e+00> : vector<8xf32>
    %29 = vector.multi_reduction <add>, %28, %cst_20 [0] : vector<8x8xf32> to vector<8xf32>
    %30 = vector.shape_cast %29 : vector<8xf32> to vector<1x8xf32>
    %31 = vector.broadcast %30 : vector<1x8xf32> to vector<8x8xf32>
    %32 = arith.divf %28, %31 : vector<8x8xf32>
    %c0_21 = arith.constant 0 : index
    %c0_22 = arith.constant 0 : index
    %33 = vector.load %arg12[%c0_21, %c0_22] : memref<8x128xf32, #tpu.memory_space<vmem>>, vector<8x128xf32>
    %cst_23 = arith.constant dense<0.000000e+00> : vector<8x128xf32>
    %34 = tpu.matmul %32, %33, %cst_23 {dimension_numbers = #tpu.dot_dimension_numbers<[1], [0], [0], [1], [0, 0, 1, 1], [], []>} : vector<8x8xf32>, vector<8x128xf32>, vector<8x128xf32> -> vector<8x128xf32>
    %35 = arith.mulf %34, %8 : vector<8x128xf32>
    %cst_24 = arith.constant dense<0.000000e+00> : vector<128xf32>
    %36 = vector.multi_reduction <add>, %35, %cst_24 [0] : vector<8x128xf32> to vector<128xf32>
    %37 = vector.shape_cast %36 : vector<128xf32> to vector<1x128xf32>
    %38 = arith.truncf %37 : vector<1x128xf32> to vector<1x128xbf16>
    %39 = tpu.concatenate %38, %9 in 1 : vector<1x128xbf16>, vector<1x256xbf16> -> vector<1x384xbf16>
    %c0_25 = arith.constant 0 : index
    %c0_26 = arith.constant 0 : index
    %40 = vector.load %arg13[%c0_25, %c0_26] : memref<384x256xbf16, #tpu.memory_space<vmem>>, vector<384x256xbf16>
    %cst_27 = arith.constant dense<0.000000e+00> : vector<1x256xf32>
    %41 = tpu.matmul %39, %40, %cst_27 {dimension_numbers = #tpu.dot_dimension_numbers<[1], [0], [0], [1], [0, 0, 1, 1], [], []>} : vector<1x384xbf16>, vector<384x256xbf16>, vector<1x256xf32> -> vector<1x256xf32>
    %c0_28 = arith.constant 0 : index
    %c0_29 = arith.constant 0 : index
    %42 = vector.load %arg14[%c0_28, %c0_29] : memref<1x256xf32, #tpu.memory_space<vmem>>, vector<1x256xf32>
    %43 = arith.addf %41, %42 : vector<1x256xf32>
    %cst_30 = arith.constant 0.000000e+00 : f32
    %44 = vector.broadcast %cst_30 : f32 to vector<1x256xf32>
    %45 = arith.maximumf %43, %44 : vector<1x256xf32>
    %46 = arith.truncf %45 : vector<1x256xf32> to vector<1x256xbf16>
    %47 = arith.truncf %8 : vector<8x128xf32> to vector<8x128xbf16>
    %c0_31 = arith.constant 0 : index
    %c0_32 = arith.constant 0 : index
    %48 = vector.load %arg2[%c0_31, %c0_32] : memref<16x8xbf16, #tpu.memory_space<vmem>>, vector<16x8xbf16>
    %cst_33 = arith.constant dense<0.000000e+00> : vector<16x128xf32>
    %49 = tpu.matmul %48, %47, %cst_33 {dimension_numbers = #tpu.dot_dimension_numbers<[1], [0], [0], [1], [0, 0, 1, 1], [], []>} : vector<16x8xbf16>, vector<8x128xbf16>, vector<16x128xf32> -> vector<16x128xf32>
    %50 = arith.truncf %49 : vector<16x128xf32> to vector<16x128xbf16>
    %c0_34 = arith.constant 0 : index
    %c0_35 = arith.constant 0 : index
    %51 = vector.load %arg18[%c0_34, %c0_35] : memref<128x128xbf16, #tpu.memory_space<vmem>>, vector<128x128xbf16>
    %cst_36 = arith.constant dense<0.000000e+00> : vector<16x128xf32>
    %52 = tpu.matmul %50, %51, %cst_36 {dimension_numbers = #tpu.dot_dimension_numbers<[1], [0], [0], [1], [0, 0, 1, 1], [], []>} : vector<16x128xbf16>, vector<128x128xbf16>, vector<16x128xf32> -> vector<16x128xf32>
    %c0_37 = arith.constant 0 : index
    %c0_38 = arith.constant 0 : index
    %53 = vector.load %arg5[%c0_37, %c0_38] : memref<16x128xf32, #tpu.memory_space<vmem>>, vector<16x128xf32>
    %54 = arith.addf %52, %53 : vector<16x128xf32>
    %c0_39 = arith.constant 0 : index
    %c0_40 = arith.constant 0 : index
    %55 = vector.load %arg3[%c0_39, %c0_40] : memref<8x16xf32, #tpu.memory_space<vmem>>, vector<8x16xf32>
    %cst_41 = arith.constant dense<0.000000e+00> : vector<8x128xf32>
    %56 = tpu.matmul %55, %54, %cst_41 {dimension_numbers = #tpu.dot_dimension_numbers<[1], [0], [0], [1], [0, 0, 1, 1], [], []>} : vector<8x16xf32>, vector<16x128xf32>, vector<8x128xf32> -> vector<8x128xf32>
    %c0_42 = arith.constant 0 : index
    %c0_43 = arith.constant 0 : index
    %57 = vector.load %arg16[%c0_42, %c0_43] : memref<256x128xbf16, #tpu.memory_space<vmem>>, vector<256x128xbf16>
    %cst_44 = arith.constant dense<0.000000e+00> : vector<1x128xf32>
    %58 = tpu.matmul %46, %57, %cst_44 {dimension_numbers = #tpu.dot_dimension_numbers<[1], [0], [0], [1], [0, 0, 1, 1], [], []>} : vector<1x256xbf16>, vector<256x128xbf16>, vector<1x128xf32> -> vector<1x128xf32>
    %c0_45 = arith.constant 0 : index
    %c0_46 = arith.constant 0 : index
    %59 = vector.load %arg17[%c0_45, %c0_46] : memref<128x128xbf16, #tpu.memory_space<vmem>>, vector<128x128xbf16>
    %cst_47 = arith.constant dense<0.000000e+00> : vector<8x128xf32>
    %60 = tpu.matmul %47, %59, %cst_47 {dimension_numbers = #tpu.dot_dimension_numbers<[1], [0], [0], [1], [0, 0, 1, 1], [], []>} : vector<8x128xbf16>, vector<128x128xbf16>, vector<8x128xf32> -> vector<8x128xf32>
    %61 = vector.broadcast %58 : vector<1x128xf32> to vector<8x128xf32>
    %62 = arith.addf %61, %60 : vector<8x128xf32>
    %63 = arith.addf %62, %56 : vector<8x128xf32>
    %c0_48 = arith.constant 0 : index
    %c0_49 = arith.constant 0 : index
    %64 = vector.load %arg19[%c0_48, %c0_49] : memref<1x128xf32, #tpu.memory_space<vmem>>, vector<1x128xf32>
    %65 = vector.broadcast %64 : vector<1x128xf32> to vector<8x128xf32>
    %66 = arith.addf %63, %65 : vector<8x128xf32>
    %cst_50 = arith.constant 0.000000e+00 : f32
    %67 = vector.broadcast %cst_50 : f32 to vector<8x128xf32>
    %68 = arith.maximumf %66, %67 : vector<8x128xf32>
    %c0_51 = arith.constant 0 : index
    %c0_52 = arith.constant 0 : index
    %69 = vector.load %arg4[%c0_51, %c0_52] : memref<8x1xf32, #tpu.memory_space<vmem>>, vector<8x1xf32>
    %cst_53 = arith.constant 5.000000e-01 : f32
    %70 = vector.broadcast %cst_53 : f32 to vector<8x1xf32>
    %71 = arith.cmpf ogt, %69, %70 : vector<8x1xf32>
    %72 = vector.shape_cast %71 : vector<8x1xi1> to vector<8x1xi1>
    %73 = vector.broadcast %72 : vector<8x1xi1> to vector<8x128xi1>
    %74 = arith.select %73, %68, %8 : vector<8x128xi1>, vector<8x128xf32>
    %75 = arith.truncf %45 : vector<1x256xf32> to vector<1x256xbf16>
    %76 = arith.truncf %74 : vector<8x128xf32> to vector<8x128xbf16>
    %c0_54 = arith.constant 0 : index
    %c0_55 = arith.constant 0 : index
    %77 = vector.load %arg8[%c0_54, %c0_55] : memref<256x128xbf16, #tpu.memory_space<vmem>>, vector<256x128xbf16>
    %cst_56 = arith.constant dense<0.000000e+00> : vector<1x128xf32>
    %78 = tpu.matmul %75, %77, %cst_56 {dimension_numbers = #tpu.dot_dimension_numbers<[1], [0], [0], [1], [0, 0, 1, 1], [], []>} : vector<1x256xbf16>, vector<256x128xbf16>, vector<1x128xf32> -> vector<1x128xf32>
    %c0_57 = arith.constant 0 : index
    %c0_58 = arith.constant 0 : index
    %79 = vector.load %arg9[%c0_57, %c0_58] : memref<128x128xbf16, #tpu.memory_space<vmem>>, vector<128x128xbf16>
    %cst_59 = arith.constant dense<0.000000e+00> : vector<8x128xf32>
    %80 = tpu.matmul %76, %79, %cst_59 {dimension_numbers = #tpu.dot_dimension_numbers<[1], [0], [0], [1], [0, 0, 1, 1], [], []>} : vector<8x128xbf16>, vector<128x128xbf16>, vector<8x128xf32> -> vector<8x128xf32>
    %81 = vector.broadcast %78 : vector<1x128xf32> to vector<8x128xf32>
    %82 = arith.addf %81, %80 : vector<8x128xf32>
    %c0_60 = arith.constant 0 : index
    %c0_61 = arith.constant 0 : index
    %83 = vector.load %arg10[%c0_60, %c0_61] : memref<1x128xf32, #tpu.memory_space<vmem>>, vector<1x128xf32>
    %84 = vector.broadcast %83 : vector<1x128xf32> to vector<8x128xf32>
    %85 = arith.addf %82, %84 : vector<8x128xf32>
    %86 = math.tanh %85 : vector<8x128xf32>
    %87 = arith.truncf %86 : vector<8x128xf32> to vector<8x128xbf16>
    %c0_62 = arith.constant 0 : index
    %c0_63 = arith.constant 0 : index
    %88 = vector.load %arg11[%c0_62, %c0_63] : memref<128x8xbf16, #tpu.memory_space<vmem>>, vector<128x8xbf16>
    %cst_64 = arith.constant dense<0.000000e+00> : vector<8x8xf32>
    %89 = tpu.matmul %87, %88, %cst_64 {dimension_numbers = #tpu.dot_dimension_numbers<[1], [0], [0], [1], [0, 0, 1, 1], [], []>} : vector<8x128xbf16>, vector<128x8xbf16>, vector<8x8xf32> -> vector<8x8xf32>
    %cst_65 = arith.constant dense<0xFF800000> : vector<8xf32>
    %90 = vector.multi_reduction <maximumf>, %89, %cst_65 [0] : vector<8x8xf32> to vector<8xf32>
    %91 = vector.shape_cast %90 : vector<8xf32> to vector<1x8xf32>
    %92 = vector.broadcast %91 : vector<1x8xf32> to vector<8x8xf32>
    %93 = arith.subf %89, %92 : vector<8x8xf32>
    %94 = math.exp %93 : vector<8x8xf32>
    %cst_66 = arith.constant dense<0.000000e+00> : vector<8xf32>
    %95 = vector.multi_reduction <add>, %94, %cst_66 [0] : vector<8x8xf32> to vector<8xf32>
    %96 = vector.shape_cast %95 : vector<8xf32> to vector<1x8xf32>
    %97 = vector.broadcast %96 : vector<1x8xf32> to vector<8x8xf32>
    %98 = arith.divf %94, %97 : vector<8x8xf32>
    %c0_67 = arith.constant 0 : index
    %c0_68 = arith.constant 0 : index
    %99 = vector.load %arg12[%c0_67, %c0_68] : memref<8x128xf32, #tpu.memory_space<vmem>>, vector<8x128xf32>
    %cst_69 = arith.constant dense<0.000000e+00> : vector<8x128xf32>
    %100 = tpu.matmul %98, %99, %cst_69 {dimension_numbers = #tpu.dot_dimension_numbers<[1], [0], [0], [1], [0, 0, 1, 1], [], []>} : vector<8x8xf32>, vector<8x128xf32>, vector<8x128xf32> -> vector<8x128xf32>
    %101 = arith.mulf %100, %74 : vector<8x128xf32>
    %cst_70 = arith.constant dense<0.000000e+00> : vector<128xf32>
    %102 = vector.multi_reduction <add>, %101, %cst_70 [0] : vector<8x128xf32> to vector<128xf32>
    %103 = vector.shape_cast %102 : vector<128xf32> to vector<1x128xf32>
    %104 = arith.truncf %103 : vector<1x128xf32> to vector<1x128xbf16>
    %105 = tpu.concatenate %104, %75 in 1 : vector<1x128xbf16>, vector<1x256xbf16> -> vector<1x384xbf16>
    %c0_71 = arith.constant 0 : index
    %c0_72 = arith.constant 0 : index
    %106 = vector.load %arg13[%c0_71, %c0_72] : memref<384x256xbf16, #tpu.memory_space<vmem>>, vector<384x256xbf16>
    %cst_73 = arith.constant dense<0.000000e+00> : vector<1x256xf32>
    %107 = tpu.matmul %105, %106, %cst_73 {dimension_numbers = #tpu.dot_dimension_numbers<[1], [0], [0], [1], [0, 0, 1, 1], [], []>} : vector<1x384xbf16>, vector<384x256xbf16>, vector<1x256xf32> -> vector<1x256xf32>
    %c0_74 = arith.constant 0 : index
    %c0_75 = arith.constant 0 : index
    %108 = vector.load %arg14[%c0_74, %c0_75] : memref<1x256xf32, #tpu.memory_space<vmem>>, vector<1x256xf32>
    %109 = arith.addf %107, %108 : vector<1x256xf32>
    %cst_76 = arith.constant 0.000000e+00 : f32
    %110 = vector.broadcast %cst_76 : f32 to vector<1x256xf32>
    %111 = arith.maximumf %109, %110 : vector<1x256xf32>
    %c0_77 = arith.constant 0 : index
    %c0_78 = arith.constant 0 : index
    %112 = vector.load %arg20[%c0_77, %c0_78] : memref<1x256xf32, #tpu.memory_space<vmem>>, vector<1x256xf32>
    tpu.vector_store %arg20[%c0_77, %c0_78], %111 {strides = array<i32>} : memref<1x256xf32, #tpu.memory_space<vmem>>, vector<1x256xf32>,
    return
  }
}

</mosaic_0001>

<bundles_post_ra>
// kernel: tpu_custom_call.1
= control target key start
LH: loop header
LB: loop body
LE: loop exit
PB: predicated region body
PF: predicated region fallthrough
CT: control target
= control target key end

     0   :  { %s3339_s0 = inlined_call_operand.hbm [shape: f32[1,128], index: 0, kind: input, shape index: {}]   ;;  %s3340_s1 = inlined_call_operand.hbm [shape: f32[8,128], index: 1, kind: input, shape index: {}]   ;;  %s3341_s2 = inlined_call_operand.vmem [shape: bf16[16,8], index: 2, kind: input, shape index: {}]   ;;  %s3342_s3 = inlined_call_operand.hbm [shape: f32[8,16], index: 3, kind: input, shape index: {}]   ;;  %s3343_s4 = inlined_call_operand.vmem [shape: f32[8,1], index: 4, kind: input, shape index: {}]   ;;  %s3344_s5 = inlined_call_operand.vmem [shape: f32[16,128], index: 5, kind: input, shape index: {}]   ;;  %s3345_s6 = inlined_call_operand.hbm [shape: bf16[128,256], index: 6, kind: input, shape index: {}]   ;;  %s3346_s7 = inlined_call_operand.vmem [shape: f32[1,256], index: 7, kind: input, shape index: {}]   ;;  %s3347_s8 = inlined_call_operand.hbm [shape: bf16[256,128], index: 8, kind: input, shape index: {}]   ;;  %s3348_s9 = inlined_call_operand.vmem [shape: bf16[128,128], index: 9, kind: input, shape index: {}]   ;;  %s3349_s10 = inlined_call_operand.vmem [shape: f32[1,128], index: 10, kind: input, shape index: {}]   ;;  %s3350_s11 = inlined_call_operand.vmem [shape: bf16[128,8], index: 11, kind: input, shape index: {}]   ;;  %s3351_s12 = inlined_call_operand.vmem [shape: f32[8,128], index: 12, kind: input, shape index: {}]   ;;  %s3352_s13 = inlined_call_operand.hbm [shape: bf16[384,256], index: 13, kind: input, shape index: {}]   ;;  %s3353_s14 = inlined_call_operand.vmem [shape: f32[1,256], index: 14, kind: input, shape index: {}]   ;;  %s3354_s15 = inlined_call_operand.hbm [shape: bf16[256,128], index: 15, kind: input, shape index: {}]   ;;  %s3355_s16 = inlined_call_operand.hbm [shape: bf16[256,128], index: 16, kind: input, shape index: {}]   ;;  %s3356_s17 = inlined_call_operand.hbm [shape: bf16[128,128], index: 17, kind: input, shape index: {}]   ;;  %s3357_s18 = inlined_call_operand.hbm [shape: bf16[128,128], index: 18, kind: input, shape index: {}]   ;;  %s3358_s19 = inlined_call_operand.vmem [shape: f32[1,128], index: 19, kind: input, shape index: {}]   ;;  %s3359_s20 = inlined_call_operand.hbm [shape: f32[1,256], index: 20, kind: output, shape index: {}]  }
   0x1   :  { %3398 = sst [smem:[#allocation65_spill]] %s3339_s0 }
   0x2   :  { %3399 = sst [smem:[#allocation66_spill]] %s3340_s1 }
   0x3   :  { %3400 = sst [smem:[#allocation67_spill]] %s3341_s2 }
   0x4   :  { %3401 = sst [smem:[#allocation68_spill]] %s3342_s3 }
   0x5   :  { %3402 = sst [smem:[#allocation69_spill]] %s3343_s4 }
   0x6   :  { %3403 = sst [smem:[#allocation70_spill]] %s3359_s20 }
   0x7   :  { %25 = vsyncpa [#allocation3], 0 }
   0x8   :  { %26 = vsyncpa [#allocation6], 0 }
   0x9   :  { %27 = vsyncpa [#allocation9], 0 }
   0xa   :  { %28 = vsyncpa [#allocation12], 0 }
   0xb   :  { %29 = vsyncpa [#allocation15], 0 }
   0xc   :  { %30 = vsyncpa [#allocation18], 0  ;;  %s3404_s23 = sld [smem:[#allocation66_spill]] }
  0x12   :  { %s48_s24 = sshll.u32 %s3404_s23, 4  ;;  %s49_s24 = int_to_ptr.hbm [resolvable:$true] %s48_s24 }
  0x13   :  { %31 = vsyncpa [#allocation4], 0  ;;  %s2698_s2 = smov [#allocation5]   ;;  %s75_s27 = sshll.u32 %s3345_s6, 4  ;;  %s76_s27 = int_to_ptr.hbm [resolvable:$true] %s75_s27 }
  0x14   :  { %s50_s25 = sshll.u32 %s2698_s2, 4  ;;  %s2699_s28 = smov [#allocation8]   ;;  %s51_s25 = int_to_ptr.vmem [resolvable:$true] %s50_s25 }
  0x15   :  { %53 = dma.hbm_to_vmem [thread:$0]  %s49_s24, 128, %s51_s25, [#allocation6]  }
  0x16   :  { %s77_s4 = sshll.u32 %s2699_s28, 4  ;;  %s2700_s29 = smov 128   ;;  %s78_s4 = int_to_ptr.vmem [resolvable:$true] %s77_s4 }
  0x17   :  { %s2701_s30 = smov 8   ;;  %s111_s1 = sshll.u32 %s3352_s13, 4  ;;  %s112_s1 = int_to_ptr.hbm [resolvable:$true] %s111_s1 }
  0x18   :  { %83 = dma.hbm_to_vmem [thread:$0]  %s76_s27, 2048, %s78_s4, [#allocation9], %s2700_s29, %s2700_s29, %s2701_s30  }
  0x19   :  { %s2702_s22 = smov [#allocation11]   ;;  %s139_s6 = sshll.u32 %s3355_s16, 4  ;;  %s140_s6 = int_to_ptr.hbm [resolvable:$true] %s139_s6 }
  0x1a   :  { %s113_s23 = sshll.u32 %s2702_s22, 4  ;;  %s2703_s24 = smov [#allocation14]   ;;  %s114_s23 = int_to_ptr.vmem [resolvable:$true] %s113_s23 }
  0x1b   :  { %119 = dma.hbm_to_vmem [thread:$0]  %s112_s1, 6144, %s114_s23, [#allocation12], %s2700_s29, %s2700_s29, %s2701_s30  }
  0x1c   :  { %s141_s25 = sshll.u32 %s2703_s24, 4  ;;  %s3405_s20 = sld [smem:[#allocation65_spill]]  ;;  %s142_s25 = int_to_ptr.vmem [resolvable:$true] %s141_s25 }
  0x1d   :  { %s2704_s4 = smov 64   ;;  %s2705_s13 = smov 4  }
  0x1e   :  { %147 = dma.hbm_to_vmem [thread:$0]  %s140_s6, 2048, %s142_s25, [#allocation15], %s2704_s4, %s2704_s4, %s2705_s13  }
  0x1f   :  { %s3406_s0 = sld [smem:[#allocation68_spill]]  ;;  %s2706_s16 = smov [#allocation2]  }
  0x20   :  { %s39_s1 = sshll.u32 %s2706_s16, 4  ;;  %s2707_s22 = smov [#allocation7]   ;;  %s40_s1 = int_to_ptr.vmem [resolvable:$true] %s39_s1 }
  0x21   :  { %s63_s23 = sshll.u32 %s2707_s22, 4  ;;  %s90_s3 = sshll.u32 %s3347_s8, 4  ;;  %s64_s23 = int_to_ptr.vmem [resolvable:$true] %s63_s23  ;;  %s91_s3 = int_to_ptr.hbm [resolvable:$true] %s90_s3 }
  0x22   :  { %s37_s27 = sshll.u32 %s3405_s20, 4  ;;  %s126_s25 = sshll.u32 %s3354_s15, 4  ;;  %s38_s27 = int_to_ptr.hbm [resolvable:$true] %s37_s27  ;;  %s127_s25 = int_to_ptr.hbm [resolvable:$true] %s126_s25 }
  0x23   :  { %42 = dma.hbm_to_vmem [thread:$0]  %s38_s27, 16, %s40_s1, [#allocation3]  }
  0x24   :  { %s2708_s26 = smov [#allocation10]   ;;  %s2709_s27 = smov [#allocation13]  }
  0x25   :  { %s61_s21 = sshll.u32 %s3406_s0, 4  ;;  %s92_s28 = sshll.u32 %s2708_s26, 4  ;;  %s62_s21 = int_to_ptr.hbm [resolvable:$true] %s61_s21  ;;  %s93_s28 = int_to_ptr.vmem [resolvable:$true] %s92_s28 }
  0x26   :  { %66 = dma.hbm_to_vmem [thread:$0]  %s62_s21, 128, %s64_s23, [#allocation6]  }
  0x27   :  { %98 = dma.hbm_to_vmem [thread:$0]  %s91_s3, 2048, %s93_s28, [#allocation9], %s2704_s4, %s2704_s4, %s2705_s13  }
  0x28   :  { %s128_s29 = sshll.u32 %s2709_s27, 4  ;;  %s152_s8 = sshll.u32 %s3356_s17, 4  ;;  %s129_s29 = int_to_ptr.vmem [resolvable:$true] %s128_s29  ;;  %s153_s8 = int_to_ptr.hbm [resolvable:$true] %s152_s8 }
  0x29   :  { %134 = dma.hbm_to_vmem [thread:$0]  %s127_s25, 2048, %s129_s29, [#allocation12], %s2704_s4, %s2704_s4, %s2705_s13  }
  0x2a   :  { %s165_s16 = sshll.u32 %s3357_s18, 4  ;;  %s2710_s1 = smov [#allocation16]   ;;  %s166_s16 = int_to_ptr.hbm [resolvable:$true] %s165_s16 }
  0x2b   :  { %s154_s22 = sshll.u32 %s2710_s1, 4  ;;  %s2711_s23 = smov [#allocation17]   ;;  %s155_s22 = int_to_ptr.vmem [resolvable:$true] %s154_s22 }
  0x2c   :  { %160 = dma.hbm_to_vmem [thread:$0]  %s153_s8, 1024, %s155_s22, [#allocation15], %s2704_s4, %s2704_s4, %s2705_s13  }
  0x2d   :  { %s167_s17 = sshll.u32 %s2711_s23, 4  ;;  %s168_s17 = int_to_ptr.vmem [resolvable:$true] %s167_s17 }
  0x2e   :  { %173 = dma.hbm_to_vmem [thread:$0]  %s166_s16, 1024, %s168_s17, [#allocation18], %s2704_s4, %s2704_s4, %s2705_s13  }
  0x2f   :  { %2684 = dma.done.wait [#allocation3], 16  }
  0x30   :  { %2685 = vsyncadd [#allocation3], 4294967280 }
  0x31   :  { %2686 = dma.done.wait [#allocation6], 256  }
  0x32   :  { %2687 = vsyncadd [#allocation6], 4294967040 }
  0x33   :  { %2688 = dma.done.wait [#allocation9], 4096  }
  0x34   :  { %2689 = vsyncadd [#allocation9], 4294963200 }
  0x35   :  { %2690 = dma.done.wait [#allocation12], 8192  }
  0x36   :  { %2691 = vsyncadd [#allocation12], 4294959104 }
  0x37   :  { %2692 = dma.done.wait [#allocation15], 3072  }
  0x38   :  { %2693 = vsyncadd [#allocation15], 4294964224 }
  0x39   :  { %2694 = dma.done.wait [#allocation18], 1024  }
  0x3a   :  { %2695 = vsyncadd [#allocation18], 4294966272  ;;  %v1797_v0 = vld [vmem:[#allocation8 + $0x70] sm:$0xf]  ;;  %v2274_v1 = vld [vmem:[#allocation8 + $0x74] sm:$0xf0] }
  0x3b   :  { %v2273_v2 = vld [vmem:[#allocation8 + $0x74] sm:$0xf]  ;;  %v1798_v3 = vor.u32 %v2274_v1, %v1797_v0  ;;  %v1799_v4 = vld [vmem:[#allocation8 + $0x78] sm:$0xf0]  ;;  %v1789_v5 = vld [vmem:[#allocation8 + $0x60] sm:$0xf] }
  0x3c   :  { %v2272_v6 = vld [vmem:[#allocation8 + $0x64] sm:$0xf0]  ;;  %v1802_v7 = vor.u32 %v2273_v2, %v1799_v4  ;;  %v2271_v8 = vld [vmem:[#allocation8 + $0x64] sm:$0xf]  ;;  %v1791_v9 = vld [vmem:[#allocation8 + $0x68] sm:$0xf0] }
  0x3d   :  { %321 = vmatpush.bf16.msra.mxu0 %v1798_v3  ;;  %v1790_v10 = vor.u32 %v2272_v6, %v1789_v5  ;;  %v1794_v11 = vor.u32 %v2271_v8, %v1791_v9  ;;  %v1781_v12 = vld [vmem:[#allocation8 + $0x50] sm:$0xf]  ;;  %v2270_v13 = vld [vmem:[#allocation8 + $0x54] sm:$0xf0]  ;;  %v2269_v14 = vld [vmem:[#allocation8 + $0x54] sm:$0xf] }
  0x3e   :  { %334 = vmatpush.bf16.msra.mxu1 %v1802_v7  ;;  %v1783_v15 = vld [vmem:[#allocation8 + $0x58] sm:$0xf0]  ;;  %v1782_v16 = vor.u32 %v2270_v13, %v1781_v12  ;;  %v1773_v18 = vld [vmem:[#allocation8 + $0x40] sm:$0xf]  ;;  %v2268_v19 = vld [vmem:[#allocation8 + $0x44] sm:$0xf0] }
  0x3f   :  { %v1786_v17 = vor.u32 %v2269_v14, %v1783_v15  ;;  %v2267_v20 = vld [vmem:[#allocation8 + $0x44] sm:$0xf]  ;;  %v1775_v21 = vld [vmem:[#allocation8 + $0x48] sm:$0xf0]  ;;  %v1774_v22 = vor.u32 %v2268_v19, %v1773_v18  ;;  %v1765_v24 = vld [vmem:[#allocation8 + $0x30] sm:$0xf] }
  0x40   :  { %v1778_v23 = vor.u32 %v2267_v20, %v1775_v21  ;;  %v2266_v25 = vld [vmem:[#allocation8 + $0x34] sm:$0xf0]  ;;  %v2265_v26 = vld [vmem:[#allocation8 + $0x34] sm:$0xf]  ;;  %v1767_v27 = vld [vmem:[#allocation8 + $0x38] sm:$0xf0] }
  0x41   :  { %322 = vmatpush.bf16.msra.mxu0 %v1790_v10  ;;  %v1766_v28 = vor.u32 %v2266_v25, %v1765_v24  ;;  %v1770_v29 = vor.u32 %v2265_v26, %v1767_v27  ;;  %v1757_v30 = vld [vmem:[#allocation8 + $0x20] sm:$0xf]  ;;  %v2264_v31 = vld [vmem:[#allocation8 + $0x24] sm:$0xf0]  ;;  %v2263_v32 = vld [vmem:[#allocation8 + $0x24] sm:$0xf] }
  0x42   :  { %335 = vmatpush.bf16.msra.mxu1 %v1794_v11  ;;  %v1759_v33 = vld [vmem:[#allocation8 + $0x28] sm:$0xf0]  ;;  %v1758_v34 = vor.u32 %v2264_v31, %v1757_v30  ;;  %v1749_v36 = vld [vmem:[#allocation8 + $0x10] sm:$0xf]  ;;  %v2262_v37 = vld [vmem:[#allocation8 + $0x14] sm:$0xf0] }
  0x43   :  { %v1762_v35 = vor.u32 %v2263_v32, %v1759_v33  ;;  %v2261_v38 = vld [vmem:[#allocation8 + $0x14] sm:$0xf]  ;;  %v1751_v39 = vld [vmem:[#allocation8 + $0x18] sm:$0xf0]  ;;  %v1750_v40 = vor.u32 %v2262_v37, %v1749_v36  ;;  %v1741_v42 = vld [vmem:[#allocation8] sm:$0xf] }
  0x44   :  { %v1754_v41 = vor.u32 %v2261_v38, %v1751_v39  ;;  %v2260_v43 = vld [vmem:[#allocation8 + $0x4] sm:$0xf0]  ;;  %v2259_v44 = vld [vmem:[#allocation8 + $0x4] sm:$0xf]  ;;  %v1743_v45 = vld [vmem:[#allocation8 + $0x8] sm:$0xf0] }
  0x45   :  { %323 = vmatpush.bf16.msra.mxu0 %v1782_v16  ;;  %v1742_v46 = vor.u32 %v2260_v43, %v1741_v42  ;;  %v217_v47 = vld [vmem:[#allocation2] sm:$0x1]  ;;  %v1746_v48 = vor.u32 %v2259_v44, %v1743_v45  ;;  %v2867_v49 = vld [vmem:[%s3348_s9 + $0x38] sm:$0xff]  ;;  %v2869_v50 = vld [vmem:[#allocation10 + $0x38] sm:$0xff]  ;;  %vm676_vm0 = vcmask 64512   ;;  %vm1126_vm5 = vcmask 1043456  }
  0x46   :  { %336 = vmatpush.bf16.msra.mxu1 %v1786_v17  ;;  %v2871_v51 = vld [vmem:[#allocation10 + $0x78] sm:$0xff]  ;;  %v218_v52 = vpack.c.bf16 %v217_v47, %v217_v47  ;;  %487 = vmatpush.bf16.msra.mxu2 %v2869_v50  ;;  %v2875_v53 = vld [vmem:[#allocation10 + $0x30] sm:$0xff]  ;;  %v2886_v56 = vld [vmem:[#allocation10 + $0x28] sm:$0xff]  ;;  %s3432_s29 = sld [smem:[#allocation67_spill]]  ;;  %vm1226_vm6 = vcmask 130048   ;;  %vm1709_vm13 = vcmask 1040384  }
  0x47   :  { %500 = vmatpush.bf16.msra.mxu3 %v2871_v51  ;;  %v2877_v54 = vld [vmem:[#allocation10 + $0x70] sm:$0xff]  ;;  %v2883_v55 = vld [vmem:[%s3348_s9 + $0x30] sm:$0xff]  ;;  %v2889_v57 = vld [vmem:[#allocation10 + $0x68] sm:$0xff]  ;;  %s3448_s16 = sld [smem:[#allocation69_spill]] }
  0x48   :  { %v2895_v58 = vld [vmem:[%s3348_s9 + $0x28] sm:$0xff]  ;;  %v2898_v59 = vld [vmem:[#allocation10 + $0x20] sm:$0xff]  ;;  %v2907_v61 = vld [vmem:[%s3348_s9 + $0x20] sm:$0xff]  ;;  %s3485_s18 = sld [smem:[#allocation70_spill]] }
  0x49   :  { %324 = vmatpush.bf16.msra.mxu0 %v1774_v22  ;;  %v2901_v60 = vld [vmem:[#allocation10 + $0x60] sm:$0xff]  ;;  %v2910_v62 = vld [vmem:[#allocation10 + $0x18] sm:$0xff]  ;;  %v2118_v3 = vld [vmem:[#allocation11 + $0x170] sm:$0xf] }
  0x4a   :  { %337 = vmatpush.bf16.msra.mxu1 %v1778_v23  ;;  %488 = vmatpush.bf16.msra.mxu2 %v2875_v53  ;;  %v2913_v63 = vld [vmem:[#allocation10 + $0x58] sm:$0xff]  ;;  %v2919_v0 = vld [vmem:[%s3348_s9 + $0x18] sm:$0xff]  ;;  %v2939_v5 = vld [vmem:[%s3348_s9] sm:$0xff] }
  0x4b   :  { %501 = vmatpush.bf16.msra.mxu3 %v2877_v54  ;;  %v2927_v1 = vld [vmem:[%s3348_s9 + $0x10] sm:$0xff]  ;;  %v2933_v2 = vld [vmem:[%s3348_s9 + $0x8] sm:$0xff]  ;;  %v2352_v9 = vld [vmem:[#allocation11 + $0x164] sm:$0xf0] }
  0x4c   :  { %v2354_v4 = vld [vmem:[#allocation11 + $0x174] sm:$0xf0]  ;;  %v2941_v6 = vld [vmem:[#allocation5] sm:$0xff]  ;;  %v2110_v8 = vld [vmem:[#allocation11 + $0x160] sm:$0xf] }
  0x4d   :  { %325 = vmatpush.bf16.msra.mxu0 %v1766_v28  ;;  %v2943_v7 = vor.u32 %v2354_v4, %v2118_v3  ;;  %v2947_v10 = vpack.c.bf16 %v2941_v6, %v2941_v6  ;;  %v2951_v11 = vor.u32 %v2352_v9, %v2110_v8  ;;  %v2102_v12 = vld [vmem:[#allocation11 + $0x150] sm:$0xf]  ;;  %v2350_v13 = vld [vmem:[#allocation11 + $0x154] sm:$0xf0]  ;;  %v2094_v15 = vld [vmem:[#allocation11 + $0x140] sm:$0xf] }
  0x4e   :  { %338 = vmatpush.bf16.msra.mxu1 %v1770_v29  ;;  %489 = vmatpush.bf16.msra.mxu2 %v2886_v56  ;;  %v2955_v14 = vor.u32 %v2350_v13, %v2102_v12  ;;  %v2348_v16 = vld [vmem:[#allocation11 + $0x144] sm:$0xf0]  ;;  %v2086_v18 = vld [vmem:[#allocation11 + $0x130] sm:$0xf]  ;;  %v2346_v19 = vld [vmem:[#allocation11 + $0x134] sm:$0xf0] }
  0x4f   :  { %502 = vmatpush.bf16.msra.mxu3 %v2889_v57  ;;  %3407 = vst [vmem:[#allocation27_spill] sm:$0xff] %v2947_v10  ;;  %v2958_v17 = vor.u32 %v2348_v16, %v2094_v15  ;;  %v2961_v20 = vor.u32 %v2346_v19, %v2086_v18  ;;  %v2078_v21 = vld [vmem:[#allocation11 + $0x120] sm:$0xf]  ;;  %v2344_v22 = vld [vmem:[#allocation11 + $0x124] sm:$0xf0]  ;;  %v2964_v23 = vld [vmem:[#allocation10 + $0x10] sm:$0xff] }
  0x50   :  { %v2966_v24 = vld [vmem:[#allocation10 + $0x50] sm:$0xff]  ;;  %v2968_v25 = vor.u32 %v2344_v22, %v2078_v21  ;;  %v2342_v27 = vld [vmem:[#allocation11 + $0x114] sm:$0xf0]  ;;  %v2973_v28 = vld [vmem:[#allocation10 + $0x8] sm:$0xff]  ;;  %s1724_s4 = sshll.u32 %s3485_s18, 4  ;;  %s1725_s4 = int_to_ptr.hbm [resolvable:$true] %s1724_s4 }
  0x51   :  { %326 = vmatpush.bf16.msra.mxu0 %v1758_v34  ;;  %3408 = vst [vmem:[#allocation28_spill] sm:$0xff] %v2961_v20  ;;  %v2070_v26 = vld [vmem:[#allocation11 + $0x110] sm:$0xf]  ;;  %v2975_v29 = vld [vmem:[#allocation10 + $0x48] sm:$0xff]  ;;  %v2062_v31 = vld [vmem:[#allocation11 + $0x100] sm:$0xf] }
  0x52   :  { %339 = vmatpush.bf16.msra.mxu1 %v1762_v35  ;;  %490 = vmatpush.bf16.msra.mxu2 %v2898_v59  ;;  %3409 = vst [vmem:[#allocation29_spill] sm:$0xff] %v2968_v25  ;;  %v2977_v30 = vor.u32 %v2342_v27, %v2070_v26  ;;  %v2340_v32 = vld [vmem:[#allocation11 + $0x104] sm:$0xf0]  ;;  %v2982_v33 = vld [vmem:[#allocation10] sm:$0xff]  ;;  %v235_v36 = vld [vmem:[%s3346_s7] sm:$0x3] }
  0x53   :  { %503 = vmatpush.bf16.msra.mxu3 %v2901_v60  ;;  %v2984_v34 = vld [vmem:[#allocation10 + $0x40] sm:$0xff]  ;;  %v2986_v35 = vor.u32 %v2340_v32, %v2062_v31  ;;  %v317_v37 = vperm.slane %v235_v36, 0  ;;  %v318_v38 = vperm.slane %v235_v36, 1  ;;  %v3016_v15 = vld [vmem:[%s3350_s11 + $0x28] sm:$0xff]  ;;  %v3022_v16 = vld [vmem:[%s3350_s11 + $0x20] sm:$0xff] }
  0x54   :  { %3410 = vst [vmem:[#allocation30_spill] sm:$0xff] %v2977_v30  ;;  %v2997_v45 = vld [vmem:[%s3350_s11 + $0x38] sm:$0xff]  ;;  %v3003_v47 = vld [vmem:[%s3350_s11 + $0x30] sm:$0xff]  ;;  %v3040_v21 = vld [vmem:[%s3350_s11 + $0x8] sm:$0xff] }
  0x55   :  { %327 = vmatpush.bf16.msra.mxu0 %v1750_v40  ;;  %3411 = vst [vmem:[#allocation31_spill] sm:$0xff] %v2986_v35  ;;  %v3028_v18 = vld [vmem:[%s3350_s11 + $0x18] sm:$0xff]  ;;  %v3034_v19 = vld [vmem:[%s3350_s11 + $0x10] sm:$0xff]  ;;  %v3046_v22 = vld [vmem:[%s3350_s11] sm:$0xff] }
  0x56   :  { %340 = vmatpush.bf16.msra.mxu1 %v1754_v41  ;;  %491 = vmatpush.bf16.msra.mxu2 %v2910_v62  ;;  %3412 = vst [vmem:[#allocation32_spill] sm:$0xff] %v2997_v45 }
  0x57   :  { %504 = vmatpush.bf16.msra.mxu3 %v2913_v63  ;;  %3413 = vst [vmem:[#allocation33_spill] sm:$0xff] %v3003_v47 }
  0x58   :  { %3414 = vst [vmem:[#allocation34_spill] sm:$0xff] %v3016_v15 }
  0x59   :  { %328 = vmatpush.bf16.msra.mxu0 %v1742_v46  ;;  %3415 = vst [vmem:[#allocation35_spill] sm:$0xff] %v3022_v16 }
  0x5a   :  { %341 = vmatpush.bf16.msra.mxu1 %v1746_v48  ;;  %492 = vmatpush.bf16.msra.mxu2 %v2964_v23  ;;  %3416 = vst [vmem:[#allocation36_spill] sm:$0xff] %v3028_v18 }
  0x5b   :  { %505 = vmatpush.bf16.msra.mxu3 %v2966_v24  ;;  %3417 = vst [vmem:[#allocation37_spill] sm:$0xff] %v3034_v19 }
  0x5c   :  { %329 = vmatmul.bf16.vlgmr.msra.gmra.mxu0 %v218_v52  ;;  %3418 = vst [vmem:[#allocation38_spill] sm:$0xff] %v3040_v21 }
  0x5d   :  { %577 = vmatpush.bf16.msrb.mxu0 %v2867_v49  ;;  %342 = vmatmul.bf16.vlgmr.msra.gmra.mxu1 %v218_v52  ;;  %3419 = vst [vmem:[#allocation39_spill] sm:$0xff] %v3046_v22 }
  0x5e   :  { %493 = vmatpush.bf16.msra.mxu2 %v2973_v28  ;;  %663 = vmatpush.bf16.msrb.mxu1 %v2997_v45 }
  0x5f   :  { %506 = vmatpush.bf16.msra.mxu3 %v2975_v29 }
  0x61   :  { %578 = vmatpush.bf16.msrb.mxu0 %v2883_v55 }
  0x62   :  { %494 = vmatpush.bf16.msra.mxu2 %v2982_v33  ;;  %664 = vmatpush.bf16.msrb.mxu1 %v3003_v47 }
  0x63   :  { %507 = vmatpush.bf16.msra.mxu3 %v2984_v34 }
  0x65   :  { %579 = vmatpush.bf16.msrb.mxu0 %v2895_v58 }
  0x66   :  { %665 = vmatpush.bf16.msrb.mxu1 %v3016_v15  ;;  %v2120_v15 = vld [vmem:[#allocation11 + $0x178] sm:$0xf0] }
  0x69   :  { %580 = vmatpush.bf16.msrb.mxu0 %v2907_v61 }
  0x6a   :  { %666 = vmatpush.bf16.msrb.mxu1 %v3022_v16  ;;  %v2353_v16 = vld [vmem:[#allocation11 + $0x174] sm:$0xf] }
  0x6d   :  { %581 = vmatpush.bf16.msrb.mxu0 %v2919_v0 }
  0x6e   :  { %667 = vmatpush.bf16.msrb.mxu1 %v3028_v18 }
  0x71   :  { %582 = vmatpush.bf16.msrb.mxu0 %v2927_v1 }
  0x72   :  { %668 = vmatpush.bf16.msrb.mxu1 %v3034_v19 }
  0x75   :  { %583 = vmatpush.bf16.msrb.mxu0 %v2933_v2 }
  0x76   :  { %669 = vmatpush.bf16.msrb.mxu1 %v3040_v21  ;;  %v2006_v21 = vld [vmem:[#allocation11 + $0x90] sm:$0xf] }
  0x79   :  { %584 = vmatpush.bf16.msrb.mxu0 %v2939_v5 }
  0x7a   :  { %670 = vmatpush.bf16.msrb.mxu1 %v3046_v22  ;;  %v2014_v22 = vld [vmem:[#allocation11 + $0xa0] sm:$0xf] }
  0x7c   :  { %585 = vmatmul.bf16.vlgmr.msrb.gmra.mxu0 %v2947_v10 }
  0x7d   :  { %1061 = vmatpush.bf16.msra.mxu0 %v2943_v7 }
  0x81   :  { %1062 = vmatpush.bf16.msra.mxu0 %v2951_v11 }
  0x85   :  { %1063 = vmatpush.bf16.msra.mxu0 %v2955_v14 }
  0x89   :  { %1064 = vmatpush.bf16.msra.mxu0 %v2958_v17 }
  0x8d   :  { %1065 = vmatpush.bf16.msra.mxu0 %v2961_v20  ;;  %v1984_v20 = vld [vmem:[#allocation11 + $0x68] sm:$0xf0] }
  0x91   :  { %1066 = vmatpush.bf16.msra.mxu0 %v2968_v25  ;;  %v2319_v25 = vld [vmem:[#allocation11 + $0x64] sm:$0xf] }
  0x95   :  { %1067 = vmatpush.bf16.msra.mxu0 %v2977_v30 }
  0x99   :  { %1068 = vmatpush.bf16.msra.mxu0 %v2986_v35  ;;  %v2318_v35 = vld [vmem:[#allocation11 + $0x54] sm:$0xf0] }
  0xd9   :  { %v330_v39 = vpop.f32.mrf.mxu0 }
  0xda   :  { %v331_v40 = vadd.f32 %v330_v39, %v317_v37  ;;  %v343_v41 = vpop.f32.mrf.mxu1  ;;  %v3054_v37 = vld [vmem:[%s3349_s10] ss:$0 sm:$0xff] }
  0xdb   :  { %v344_v42 = vadd.f32 %v343_v41, %v318_v38  ;;  %3420 = vst [vmem:[#allocation40_spill] sm:$0xff] %v3054_v37 }
  0xdc   :  { %v347_v43 = vmax.f32 %v331_v40, 0.0 }
  0xdd   :  { %v348_v44 = vmax.f32 %v344_v42, 0.0 }
  0xdf   :  { %v350_v46 = vpack.c.bf16 %v348_v44, %v347_v43 }
  0xe1   :  { %v332_v48 = vpop.f32.mrf.mxu0  ;;  %v385_v52 = vunpack.c.l.b16 %v350_v46  ;;  %v386_v3 = vunpack.c.h.b16 %v350_v46  ;;  %v2054_v46 = vld [vmem:[#allocation11 + $0xf0] sm:$0xf] }
  0xe2   :  { %v345_v4 = vpop.f32.mrf.mxu1  ;;  %v2338_v48 = vld [vmem:[#allocation11 + $0xf4] sm:$0xf0] }
  0xe3   :  { %v3005_v8 = vpack.c.b16 %v385_v52, %v385_v52  ;;  %v3007_v9 = vpack.c.b16 %v386_v3, %v386_v3  ;;  %v3060_v52 = vld [vmem:[%s3351_s12] sm:$0xff]  ;;  %v3062_v3 = vor.u32 %v2338_v48, %v2054_v46  ;;  %v2046_v4 = vld [vmem:[#allocation11 + $0xe0] sm:$0xf]  ;;  %v2330_v48 = vld [vmem:[#allocation11 + $0xb4] sm:$0xf0] }
  0xe4   :  { %3421 = vst [vmem:[#allocation41_spill] sm:$0xff] %v3060_v52  ;;  %728 = vmatpush.msrb.mxu2 %v3060_v52  ;;  %v2022_v46 = vld [vmem:[#allocation11 + $0xb0] sm:$0xf] }
  0xe5   :  { %495 = vmatmul.bf16.vlgmr.msra.gmra.mxu2 %v3005_v8  ;;  %508 = vmatmul.bf16.vlgmr.msra.gmra.mxu3 %v3007_v9 }
  0xe6   :  { %1069 = vmatmul.bf16.vlgmr.msra.gmra.mxu0 %v3007_v9  ;;  %1048 = vmatpush.bf16.msra.mxu2 %v3062_v3 }
  0xf9   :  { %v586_v12 = vpop.f32.mrf.mxu0 }
 0x101   :  { %v588_v13 = vpop.f32.mrf.mxu0 }
 0x163   :  { %v3049_v26 = vpop.f32.mrf.mxu0 }
 0x168   :  { %v496_v27 = vpop.f32.mrf.mxu2  ;;  %v509_v31 = vpop.f32.mrf.mxu3 }
 0x169   :  { %v510_v32 = vadd.f32 %v509_v31, %v496_v27 }
 0x16b   :  { %v590_v36 = vperm.slane %v510_v32, 0  ;;  %v1072_v38 = vpop.f32.mrf.mxu0 }
 0x16c   :  { %v2334_v38 = vld [vmem:[#allocation11 + $0xd4] sm:$0xf0] }
 0x16d   :  { %v591_v39 = vadd.f32 %v590_v36, %v586_v12  ;;  %v2336_v12 = vld [vmem:[#allocation11 + $0xe4] sm:$0xf0]  ;;  %v2038_v36 = vld [vmem:[#allocation11 + $0xd0] sm:$0xf] }
 0x16e   :  { %v3066_v13 = vor.u32 %v2336_v12, %v2046_v4 }
 0x16f   :  { %v596_v40 = vadd.f32 %v3054_v37, %v591_v39  ;;  %v3070_v39 = vor.u32 %v2334_v38, %v2038_v36  ;;  %v3076_v37 = vor.u32 %v2330_v48, %v2022_v46  ;;  %v2328_v36 = vld [vmem:[#allocation11 + $0xa4] sm:$0xf0] }
 0x170   :  { %v498_v41 = vpop.f32.mrf.mxu2  ;;  %v511_v42 = vpop.f32.mrf.mxu3  ;;  %1049 = vmatpush.bf16.msra.mxu2 %v3066_v13  ;;  %v2324_v46 = vld [vmem:[#allocation11 + $0x84] sm:$0xf0] }
 0x171   :  { %2407 = vtanh.f32 %v596_v40  ;;  %v2030_v42 = vld [vmem:[#allocation11 + $0xc0] sm:$0xf] }
 0x174   :  { %1050 = vmatpush.bf16.msra.mxu2 %v3070_v39 }
 0x177   :  { %v2408_v43 = vpop.eup %2407 }
 0x178   :  { %v598_v44 = vpack.c.bf16 %v2408_v43, %v2408_v43  ;;  %v2332_v43 = vld [vmem:[#allocation11 + $0xc4] sm:$0xf0] }
 0x17a   :  { %671 = vmatmul.bf16.vlgmr.msrb.gmra.mxu1 %v598_v44  ;;  %v3073_v44 = vor.u32 %v2332_v43, %v2030_v42  ;;  %v2326_v42 = vld [vmem:[#allocation11 + $0x94] sm:$0xf0] }
 0x17c   :  { %1051 = vmatpush.bf16.msra.mxu2 %v3073_v44 }
 0x180   :  { %1052 = vmatpush.bf16.msra.mxu2 %v3076_v37 }
 0x1f7   :  { %v672_v27 = vpop.f32.mrf.mxu1 }
 0x1f8   :  { %v677_v31 = vsel %vm676_vm0, %v672_v27, -inf }
 0x1f9   :  { %v678_v32 = vrot.slane %v677_v31, 4 }
 0x1fb   :  { %v679_v40 = vmax.f32 %v677_v31, %v678_v32  ;;  %v3079_v31 = vor.u32 %v2328_v36, %v2014_v22 }
 0x1fd   :  { %v680_v41 = vrot.slane %v679_v40, 2  ;;  %1053 = vmatpush.bf16.msra.mxu2 %v3079_v31 }
 0x1ff   :  { %v681_v4 = vmax.f32 %v679_v40, %v680_v41  ;;  %v674_v12 = vpop.f32.mrf.mxu1  ;;  %v3082_v40 = vor.u32 %v2326_v42, %v2006_v21  ;;  %v1998_v41 = vld [vmem:[#allocation11 + $0x80] sm:$0xf] }
 0x200   :  { %v3085_v48 = vor.u32 %v2324_v46, %v1998_v41 }
 0x201   :  { %v682_v52 = vrot.slane %v681_v4, 1  ;;  %1054 = vmatpush.bf16.msra.mxu2 %v3082_v40 }
 0x203   :  { %v683_v38 = vmax.f32 %v681_v4, %v682_v52 }
 0x205   :  { %v684_v32 = vsub.f32 %v672_v27, %v683_v38  ;;  %1055 = vmatpush.bf16.msra.mxu2 %v3085_v48 }
 0x207   :  { %v685_v43 = vmul.f32 1.442695, %v684_v32 }
 0x209   :  { %2409 = vpow2.f32 %v685_v43 }
 0x20f   :  { %v2410_v52 = vpop.eup %2409 }
 0x210   :  { %v687_v4 = vsel %vm676_vm0, %v2410_v52, 0.0 }
 0x211   :  { %v688_v22 = vrot.slane %v687_v4, 4 }
 0x213   :  { %v689_v27 = vadd.f32 %v688_v22, %v687_v4  ;;  %v3089_v22 = vor.u32 %v2353_v16, %v2120_v15  ;;  %v2088_v15 = vld [vmem:[#allocation11 + $0x138] sm:$0xf0] }
 0x215   :  { %v690_v12 = vrot.slane %v689_v27, 2 }
 0x217   :  { %v691_v36 = vadd.f32 %v690_v12, %v689_v27  ;;  %v2351_v12 = vld [vmem:[#allocation11 + $0x164] sm:$0xf] }
 0x219   :  { %v692_v38 = vrot.slane %v691_v36, 1 }
 0x21b   :  { %v693_v32 = vadd.f32 %v692_v38, %v691_v36  ;;  %v2112_v36 = vld [vmem:[#allocation11 + $0x168] sm:$0xf0] }
 0x21c   :  { %v3093_v38 = vor.u32 %v2351_v12, %v2112_v36  ;;  %v2320_v36 = vld [vmem:[#allocation11 + $0x64] sm:$0xf0] }
 0x21d   :  { %2411 = vrcp.f32 %v693_v32  ;;  %v705_v19 = vand.u32 2147483648, %v693_v32  ;;  %v703_v41 = vand.u32 2147483647, %v693_v32  ;;  %vm699_vm2 = vweird.f32 %v693_v32 }
 0x21f   :  { %v706_v47 = vor.u32 1.1754944e-38, %v705_v19  ;;  %vm704_vm4 = vcmp.eq.f32.partialorder %v703_v41, 8.507059e+37  ;;  %v2347_v19 = vld [vmem:[#allocation11 + $0x144] sm:$0xf]  ;;  %v1990_v41 = vld [vmem:[#allocation11 + $0x70] sm:$0xf] }
 0x223   :  { %v2412_v21 = vpop.eup %2411 }
 0x224   :  { %v695_v42 = vmul.f32 %v2412_v21, %v693_v32  ;;  %vm700_vm1 = vweird.f32 %v2412_v21  ;;  %v2104_v32 = vld [vmem:[#allocation11 + $0x158] sm:$0xf0] }
 0x225   :  { %vm701_vm3 = vmor %vm699_vm2, %vm700_vm1 }
 0x226   :  { %v696_v43 = vsub.f32 1.0, %v695_v42 }
 0x228   :  { %v697_v18 = vmul.f32 %v2412_v21, %v696_v43  ;;  %v2080_v43 = vld [vmem:[#allocation11 + $0x128] sm:$0xf0] }
 0x22a   :  { %v698_v46 = vadd.f32 %v2412_v21, %v697_v18  ;;  %v2349_v18 = vld [vmem:[#allocation11 + $0x154] sm:$0xf] }
 0x22b   :  { %v3096_v42 = vor.u32 %v2349_v18, %v2104_v32  ;;  %v2341_v18 = vld [vmem:[#allocation11 + $0x114] sm:$0xf]  ;;  %v2072_v32 = vld [vmem:[#allocation11 + $0x118] sm:$0xf0] }
 0x22c   :  { %v702_v45 = vsel %vm701_vm3, %v2412_v21, %v698_v46  ;;  %v2096_v21 = vld [vmem:[#allocation11 + $0x148] sm:$0xf0]  ;;  %v2322_v46 = vld [vmem:[#allocation11 + $0x74] sm:$0xf0] }
 0x22d   :  { %v707_v4 = vsel %vm704_vm4, %v706_v47, %v702_v45  ;;  %v3100_v45 = vor.u32 %v2347_v19, %v2096_v21  ;;  %v2345_v47 = vld [vmem:[#allocation11 + $0x134] sm:$0xf]  ;;  %v3108_v12 = vor.u32 %v2322_v46, %v1990_v41  ;;  %v2064_v41 = vld [vmem:[#allocation11 + $0x108] sm:$0xf0]  ;;  %v3119_v46 = vor.u32 %v2319_v25, %v1984_v20 }
 0x22e   :  { %v708_v27 = vmul.f32 %v2410_v52, %v707_v4  ;;  %v3103_v16 = vor.u32 %v2345_v47, %v2088_v15  ;;  %v2343_v52 = vld [vmem:[#allocation11 + $0x124] sm:$0xf]  ;;  %v1982_v4 = vld [vmem:[#allocation11 + $0x60] sm:$0xf]  ;;  %v2321_v19 = vld [vmem:[#allocation11 + $0x74] sm:$0xf] }
 0x22f   :  { %1035 = vmatpush.bf16.msrb.mxu3 %v3108_v12  ;;  %v3111_v21 = vor.u32 %v2320_v36, %v1982_v4  ;;  %v1974_v47 = vld [vmem:[#allocation11 + $0x50] sm:$0xf]  ;;  %v1992_v15 = vld [vmem:[#allocation11 + $0x78] sm:$0xf0]  ;;  %3426 = vst [vmem:[#allocation46_spill] sm:$0xff] %v3119_v46  ;;  %v1128_v20 = vsel %vm1126_vm5, %v2947_v10, 0 }
 0x230   :  { %1931 = vmatmul.msk.f32.vlgmr.msrb.gmra.mxu2 %vm676_vm0, %v708_v27  ;;  %3422 = vst [vmem:[#allocation42_spill] sm:$0xff] %v3103_v16  ;;  %v3106_v27 = vor.u32 %v2343_v52, %v2080_v43  ;;  %v3113_v30 = vor.u32 %v2321_v19, %v1992_v15  ;;  %v3116_v52 = vor.u32 %v2341_v18, %v2072_v32  ;;  %v2339_v43 = vld [vmem:[#allocation11 + $0x104] sm:$0xf]  ;;  %v2317_v36 = vld [vmem:[#allocation11 + $0x54] sm:$0xf] }
 0x231   :  { %1100 = vmatpush.bf16.msrb.mxu2 %v3089_v22  ;;  %v3122_v4 = vor.u32 %v2318_v35, %v1974_v47  ;;  %v1966_v19 = vld [vmem:[#allocation11 + $0x40] sm:$0xf]  ;;  %v2316_v15 = vld [vmem:[#allocation11 + $0x44] sm:$0xf0]  ;;  %v2315_v35 = vld [vmem:[#allocation11 + $0x44] sm:$0xf] }
 0x232   :  { %3423 = vst [vmem:[#allocation43_spill] sm:$0xff] %v3106_v27  ;;  %1074 = vmatpush.bf16.msra.mxu1 %v3113_v30  ;;  %v3132_v25 = vor.u32 %v2316_v15, %v1966_v19  ;;  %v1968_v32 = vld [vmem:[#allocation11 + $0x48] sm:$0xf0]  ;;  %v1958_v47 = vld [vmem:[#allocation11 + $0x30] sm:$0xf] }
 0x233   :  { %3424 = vst [vmem:[#allocation44_spill] sm:$0xff] %v3113_v30  ;;  %1036 = vmatpush.bf16.msrb.mxu3 %v3111_v21  ;;  %v2314_v30 = vld [vmem:[#allocation11 + $0x34] sm:$0xf0]  ;;  %v1942_v15 = vld [vmem:[#allocation11 + $0x10] sm:$0xf] }
 0x234   :  { %3425 = vst [vmem:[#allocation45_spill] sm:$0xff] %v3116_v52  ;;  %v2335_v10 = vld [vmem:[#allocation11 + $0xe4] sm:$0xf] }
 0x235   :  { %1101 = vmatpush.bf16.msrb.mxu2 %v3093_v38 }
 0x236   :  { %1075 = vmatpush.bf16.msra.mxu1 %v3119_v46  ;;  %v2056_v46 = vld [vmem:[#allocation11 + $0xf8] sm:$0xf0] }
 0x237   :  { %1037 = vmatpush.bf16.msrb.mxu3 %v3122_v4 }
 0x238   :  { %1056 = vmatmul.bf16.vlgmr.msra.gmra.mxu2 %v3005_v8 }
 0x239   :  { %1102 = vmatpush.bf16.msrb.mxu2 %v3096_v42 }
 0x23b   :  { %1038 = vmatpush.bf16.msrb.mxu3 %v3132_v25 }
 0x23d   :  { %1103 = vmatpush.bf16.msrb.mxu2 %v3100_v45 }
 0x241   :  { %1104 = vmatpush.bf16.msrb.mxu2 %v3103_v16  ;;  %v1976_v16 = vld [vmem:[#allocation11 + $0x58] sm:$0xf0] }
 0x242   :  { %v3128_v18 = vor.u32 %v2317_v36, %v1976_v16  ;;  %v3139_v16 = vor.u32 %v2314_v30, %v1958_v47  ;;  %v2312_v36 = vld [vmem:[#allocation11 + $0x24] sm:$0xf0]  ;;  %v2355_v30 = vld [vmem:[%s3432_s29] sm:$0xff] }
 0x244   :  { %3428 = vst [vmem:[#allocation48_spill] sm:$0xff] %v3128_v18  ;;  %1076 = vmatpush.bf16.msra.mxu1 %v3128_v18  ;;  %1039 = vmatpush.bf16.msrb.mxu3 %v3139_v16 }
 0x245   :  { %1105 = vmatpush.bf16.msrb.mxu2 %v3106_v27  ;;  %v3125_v27 = vor.u32 %v2339_v43, %v2064_v41  ;;  %v3136_v43 = vor.u32 %v2315_v35, %v1968_v32  ;;  %v1950_v41 = vld [vmem:[#allocation11 + $0x20] sm:$0xf]  ;;  %v2308_v32 = vld [vmem:[#allocation11 + $0x4] sm:$0xf0] }
 0x246   :  { %v3144_v19 = vor.u32 %v2312_v36, %v1950_v41  ;;  %v2313_v41 = vld [vmem:[#allocation11 + $0x34] sm:$0xf]  ;;  %v1960_v36 = vld [vmem:[#allocation11 + $0x38] sm:$0xf0] }
 0x247   :  { %3427 = vst [vmem:[#allocation47_spill] sm:$0xff] %v3125_v27  ;;  %v3156_v18 = vor.u32 %v2313_v41, %v1960_v36  ;;  %v2309_v41 = vld [vmem:[#allocation11 + $0x14] sm:$0xf]  ;;  %v1944_v36 = vld [vmem:[#allocation11 + $0x18] sm:$0xf0] }
 0x248   :  { %3429 = vst [vmem:[#allocation49_spill] sm:$0xff] %v3136_v43  ;;  %1077 = vmatpush.bf16.msra.mxu1 %v3136_v43  ;;  %1040 = vmatpush.bf16.msrb.mxu3 %v3144_v19  ;;  %v2337_v43 = vld [vmem:[#allocation11 + $0xf4] sm:$0xf] }
 0x249   :  { %1106 = vmatpush.bf16.msrb.mxu2 %v3116_v52  ;;  %3430 = vst [vmem:[#allocation50_spill] sm:$0xff] %v3144_v19  ;;  %v2331_v52 = vld [vmem:[#allocation11 + $0xc4] sm:$0xf] }
 0x24a   :  { %3434 = vst [vmem:[#allocation53_spill] sm:$0xff] %v3156_v18 }
 0x24c   :  { %1078 = vmatpush.bf16.msra.mxu1 %v3156_v18  ;;  %v2040_v18 = vld [vmem:[#allocation11 + $0xd8] sm:$0xf0] }
 0x24d   :  { %1107 = vmatpush.bf16.msrb.mxu2 %v3125_v27 }
 0x250   :  { %1108 = vmatmul.bf16.vlgmr.msrb.gmra.mxu2 %v3007_v9  ;;  %v1934_v9 = vld [vmem:[#allocation11] sm:$0xf] }
 0x251   :  { %1137 = vmatpush.bf16.msra.mxu2 %v1128_v20  ;;  %v2310_v20 = vld [vmem:[#allocation11 + $0x14] sm:$0xf0]  ;;  %v3154_v47 = vor.u32 %v2308_v32, %v1934_v9  ;;  %v2048_v9 = vld [vmem:[#allocation11 + $0xe8] sm:$0xf0] }
 0x252   :  { %v3147_v35 = vor.u32 %v2310_v20, %v1942_v15  ;;  %v3159_v15 = vor.u32 %v2337_v43, %v2056_v46  ;;  %v2311_v20 = vld [vmem:[#allocation11 + $0x24] sm:$0xf]  ;;  %v3165_v32 = vor.u32 %v2335_v10, %v2048_v9  ;;  %v2333_v46 = vld [vmem:[#allocation11 + $0xd4] sm:$0xf]  ;;  %v3169_v43 = vor.u32 %v2309_v41, %v1944_v36  ;;  %v2024_v41 = vld [vmem:[#allocation11 + $0xb8] sm:$0xf0] }
 0x253   :  { %3433 = vst [vmem:[#allocation52_spill] sm:$0xff] %v3154_v47  ;;  %v2329_v9 = vld [vmem:[#allocation11 + $0xb4] sm:$0xf] }
 0x254   :  { %3431 = vst [vmem:[#allocation51_spill] sm:$0xff] %v3147_v35  ;;  %1041 = vmatpush.bf16.msrb.mxu3 %v3147_v35  ;;  %v3171_v35 = vor.u32 %v2333_v46, %v2040_v18  ;;  %v3181_v36 = vor.u32 %v2329_v9, %v2024_v41  ;;  %v2327_v18 = vld [vmem:[#allocation11 + $0xa4] sm:$0xf]  ;;  %v2016_v46 = vld [vmem:[#allocation11 + $0xa8] sm:$0xf0]  ;;  %v2362_v41 = vld [vmem:[#allocation17 + $0x30] sm:$0xff] }
 0x255   :  { %3435 = vst [vmem:[#allocation54_spill] sm:$0xff] %v3159_v15 }
 0x256   :  { %3437 = vst [vmem:[#allocation56_spill] sm:$0xff] %v3165_v32 }
 0x257   :  { %3438 = vst [vmem:[#allocation57_spill] sm:$0xff] %v3169_v43 }
 0x258   :  { %1042 = vmatpush.bf16.msrb.mxu3 %v3154_v47  ;;  %v2307_v47 = vld [vmem:[#allocation11 + $0x4] sm:$0xf]  ;;  %3439 = vst [vmem:[#allocation58_spill] sm:$0xff] %v3171_v35 }
 0x259   :  { %3442 = vst [vmem:[#allocation61_spill] sm:$0xff] %v3181_v36 }
 0x25c   :  { %1087 = vmatpush.bf16.msra.mxu3 %v3159_v15  ;;  %v1936_v15 = vld [vmem:[#allocation11 + $0x8] sm:$0xf0] }
 0x25d   :  { %v3174_v10 = vor.u32 %v2307_v47, %v1936_v15  ;;  %v2325_v47 = vld [vmem:[#allocation11 + $0x94] sm:$0xf]  ;;  %v2008_v15 = vld [vmem:[#allocation11 + $0x98] sm:$0xf0] }
 0x25f   :  { %3440 = vst [vmem:[#allocation59_spill] sm:$0xff] %v3174_v10 }
 0x260   :  { %2128 = vmatmul.msk.bf16.vlgmr.msra.gmra.mxu2 %vm676_vm0, %v2355_v30  ;;  %v1952_v30 = vld [vmem:[#allocation11 + $0x28] sm:$0xf0]  ;;  %1088 = vmatpush.bf16.msra.mxu3 %v3165_v32  ;;  %v2358_v32 = vld [vmem:[#allocation17 + $0x10] sm:$0xff] }
 0x261   :  { %v3163_v27 = vor.u32 %v2311_v20, %v1952_v30  ;;  %v2032_v20 = vld [vmem:[#allocation11 + $0xc8] sm:$0xf0] }
 0x262   :  { %v3177_v30 = vor.u32 %v2331_v52, %v2032_v20  ;;  %v3187_v52 = vor.u32 %v2325_v47, %v2008_v15  ;;  %v2323_v20 = vld [vmem:[#allocation11 + $0x84] sm:$0xf] }
 0x263   :  { %3436 = vst [vmem:[#allocation55_spill] sm:$0xff] %v3163_v27  ;;  %1079 = vmatpush.bf16.msra.mxu1 %v3163_v27  ;;  %v2363_v27 = vld [vmem:[#allocation17 + $0x38] sm:$0xff] }
 0x264   :  { %1089 = vmatpush.bf16.msra.mxu3 %v3171_v35  ;;  %3441 = vst [vmem:[#allocation60_spill] sm:$0xff] %v3177_v30  ;;  %v2359_v35 = vld [vmem:[#allocation17 + $0x18] sm:$0xff] }
 0x265   :  { %3444 = vst [vmem:[#allocation63_spill] sm:$0xff] %v3187_v52 }
 0x267   :  { %1080 = vmatpush.bf16.msra.mxu1 %v3169_v43  ;;  %v3184_v43 = vor.u32 %v2327_v18, %v2016_v46 }
 0x268   :  { %1090 = vmatpush.bf16.msra.mxu3 %v3177_v30 }
 0x269   :  { %3443 = vst [vmem:[#allocation62_spill] sm:$0xff] %v3184_v43 }
 0x26b   :  { %1081 = vmatpush.bf16.msra.mxu1 %v3174_v10  ;;  %v2000_v10 = vld [vmem:[#allocation11 + $0x88] sm:$0xf0] }
 0x26c   :  { %1091 = vmatpush.bf16.msra.mxu3 %v3181_v36  ;;  %v3190_v9 = vor.u32 %v2323_v20, %v2000_v10 }
 0x26e   :  { %3445 = vst [vmem:[#allocation64_spill] sm:$0xff] %v3190_v9 }
 0x26f   :  { %1211 = vmatpush.bf16.msrb.mxu1 %v2363_v27  ;;  %v2361_v27 = vld [vmem:[#allocation17 + $0x28] sm:$0xff] }
 0x270   :  { %1092 = vmatpush.bf16.msra.mxu3 %v3184_v43  ;;  %v2360_v43 = vld [vmem:[#allocation17 + $0x20] sm:$0xff] }
 0x273   :  { %1212 = vmatpush.bf16.msrb.mxu1 %v2362_v41  ;;  %v2357_v41 = vld [vmem:[#allocation17 + $0x8] sm:$0xff] }
 0x274   :  { %1093 = vmatpush.bf16.msra.mxu3 %v3187_v52 }
 0x277   :  { %1213 = vmatpush.bf16.msrb.mxu1 %v2361_v27 }
 0x278   :  { %1094 = vmatpush.bf16.msra.mxu3 %v3190_v9 }
 0x27b   :  { %1214 = vmatpush.bf16.msrb.mxu1 %v2360_v43  ;;  %v2370_v43 = vld [vmem:[#allocation14 + $0x30] sm:$0xff] }
 0x27f   :  { %1215 = vmatpush.bf16.msrb.mxu1 %v2359_v35  ;;  %v2369_v35 = vld [vmem:[#allocation14 + $0x28] sm:$0xff] }
 0x283   :  { %1216 = vmatpush.bf16.msrb.mxu1 %v2358_v32 }
 0x287   :  { %1217 = vmatpush.bf16.msrb.mxu1 %v2357_v41  ;;  %v3453_v41 = vld [vmem:[#allocation30_spill] sm:$0xff] }
 0x2b3   :  { %v730_v30 = vpop.f32.mrf.mxu2 }
 0x2b4   :  { %v733_v18 = vmul.f32 %v730_v30, %v2941_v6  ;;  %v2356_v6 = vld [vmem:[#allocation17] sm:$0xff]  ;;  %v2371_v30 = vld [vmem:[#allocation14 + $0x38] sm:$0xff] }
 0x2b5   :  { %1218 = vmatpush.bf16.msrb.mxu1 %v2356_v6  ;;  %1385 = vmatpush.bf16.msrb.mxu0 %v2371_v30  ;;  %v3454_v6 = vld [vmem:[#allocation51_spill] sm:$0xff] }
 0x2b6   :  { %v734_v46 = vrot.slane %v733_v18, 4  ;;  %v2384_v30 = vld [vmem:[#allocation16 + $0x20] sm:$0xff] }
 0x2b8   :  { %v735_v36 = vadd.f32 %v734_v46, %v733_v18 }
 0x2b9   :  { %1386 = vmatpush.bf16.msrb.mxu0 %v2370_v43  ;;  %v3455_v43 = vld [vmem:[#allocation47_spill] sm:$0xff] }
 0x2ba   :  { %v736_v47 = vrot.slane %v735_v36, 2 }
 0x2bb   :  { %v3194_v15 = vpop.f32.mrf.mxu2 }
 0x2bc   :  { %v737_v52 = vadd.f32 %v736_v47, %v735_v36 }
 0x2bd   :  { %1387 = vmatpush.bf16.msrb.mxu0 %v2369_v35  ;;  %v3457_v35 = vld [vmem:[#allocation52_spill] sm:$0xff] }
 0x2be   :  { %v738_v10 = vrot.slane %v737_v52, 1 }
 0x2c0   :  { %v739_v20 = vadd.f32 %v738_v10, %v737_v52  ;;  %v3451_v10 = vld [vmem:[#allocation50_spill] sm:$0xff] }
 0x2c2   :  { %v740_v19 = vpack.c.bf16 %v739_v20, %v739_v20  ;;  %v3452_v20 = vld [vmem:[#allocation45_spill] sm:$0xff] }
 0x2c3   :  { %v1059_v9 = vpop.f32.mrf.mxu2 }
 0x2c4   :  { %1043 = vmatmul.bf16.vlgmr.msrb.gmra.mxu3 %v740_v19  ;;  %1082 = vmatmul.bf16.vlgmr.msra.gmra.mxu1 %v740_v19 }
 0x2c5   :  { %1506 = vmatpush.bf16.msra.mxu1 %v2869_v50 }
 0x2c9   :  { %1507 = vmatpush.bf16.msra.mxu1 %v2875_v53 }
 0x2cd   :  { %1508 = vmatpush.bf16.msra.mxu1 %v2886_v56  ;;  %v2368_v56 = vld [vmem:[#allocation14 + $0x20] sm:$0xff] }
 0x2ce   :  { %1388 = vmatpush.bf16.msrb.mxu0 %v2368_v56  ;;  %v2381_v56 = vld [vmem:[#allocation16 + $0x8] sm:$0xff] }
 0x2d1   :  { %1509 = vmatpush.bf16.msra.mxu1 %v2898_v59  ;;  %v2379_v59 = vld [vmem:[#allocation14 + $0x78] sm:$0xff] }
 0x2d2   :  { %1398 = vmatpush.bf16.msrb.mxu2 %v2379_v59  ;;  %v3460_v59 = vld [vmem:[#allocation58_spill] sm:$0xff] }
 0x2d3   :  { %v3198_v36 = vpop.f32.mrf.mxu2 }
 0x2d4   :  { %1095 = vmatmul.bf16.vlgmr.msra.gmra.mxu3 %v3005_v8  ;;  %v2365_v8 = vld [vmem:[#allocation14 + $0x8] sm:$0xff] }
 0x2d5   :  { %1510 = vmatpush.bf16.msra.mxu1 %v2910_v62  ;;  %v2367_v62 = vld [vmem:[#allocation14 + $0x18] sm:$0xff] }
 0x2d6   :  { %1389 = vmatpush.bf16.msrb.mxu0 %v2367_v62  ;;  %v2380_v62 = vld [vmem:[#allocation16] sm:$0xff] }
 0x2d9   :  { %1511 = vmatpush.bf16.msra.mxu1 %v2964_v23  ;;  %v2378_v23 = vld [vmem:[#allocation14 + $0x70] sm:$0xff] }
 0x2da   :  { %1399 = vmatpush.bf16.msrb.mxu2 %v2378_v23  ;;  %v3461_v23 = vld [vmem:[#allocation60_spill] sm:$0xff] }
 0x2db   :  { %v1111_v19 = vpop.f32.mrf.mxu2 }
 0x2dc   :  { %v2383_v19 = vld [vmem:[#allocation16 + $0x18] sm:$0xff] }
 0x2dd   :  { %1512 = vmatpush.bf16.msra.mxu1 %v2973_v28  ;;  %v2366_v28 = vld [vmem:[#allocation14 + $0x10] sm:$0xff] }
 0x2de   :  { %1390 = vmatpush.bf16.msrb.mxu0 %v2366_v28  ;;  %v3462_v28 = vld [vmem:[#allocation32_spill] sm:$0xff] }
 0x2e1   :  { %1513 = vmatpush.bf16.msra.mxu1 %v2982_v33  ;;  %v2377_v33 = vld [vmem:[#allocation14 + $0x68] sm:$0xff] }
 0x2e2   :  { %1400 = vmatpush.bf16.msrb.mxu2 %v2377_v33  ;;  %1391 = vmatpush.bf16.msrb.mxu0 %v2365_v8  ;;  %v3463_v33 = vld [vmem:[#allocation61_spill] sm:$0xff]  ;;  %v3464_v8 = vld [vmem:[#allocation27_spill] sm:$0xff] }
 0x2e3   :  { %v1139_v50 = vpop.f32.mrf.mxu2 }
 0x2eb   :  { %v1141_v53 = vpop.f32.mrf.mxu2 }
 0x2ec   :  { %v1144_v32 = vpack.c.bf16 %v1141_v53, %v1139_v50  ;;  %v3458_v50 = vld [vmem:[#allocation54_spill] sm:$0xff]  ;;  %v2382_v53 = vld [vmem:[#allocation16 + $0x10] sm:$0xff] }
 0x2ee   :  { %1219 = vmatmul.bf16.vlgmr.msrb.gmra.mxu1 %v1144_v32  ;;  %v3459_v32 = vld [vmem:[#allocation56_spill] sm:$0xff] }
 0x2ef   :  { %1639 = vmatpush.bf16.msrb.mxu1 %v3062_v3  ;;  %v2364_v3 = vld [vmem:[#allocation14] sm:$0xff] }
 0x2f0   :  { %1392 = vmatpush.bf16.msrb.mxu0 %v2364_v3  ;;  %v3466_v3 = vld [vmem:[#allocation62_spill] sm:$0xff] }
 0x2f3   :  { %1640 = vmatpush.bf16.msrb.mxu1 %v3066_v13  ;;  %v2375_v13 = vld [vmem:[#allocation14 + $0x58] sm:$0xff] }
 0x2f4   :  { %1519 = vmatpush.bf16.msra.mxu0 %v2871_v51 }
 0x2f7   :  { %1641 = vmatpush.bf16.msrb.mxu1 %v3070_v39  ;;  %v2374_v39 = vld [vmem:[#allocation14 + $0x50] sm:$0xff] }
 0x2f8   :  { %1520 = vmatpush.bf16.msra.mxu0 %v2877_v54  ;;  %v3226_v54 = vld [vmem:[%s3353_s14] sm:$0x3] }
 0x2fb   :  { %1642 = vmatpush.bf16.msrb.mxu1 %v3073_v44  ;;  %v2373_v44 = vld [vmem:[#allocation14 + $0x48] sm:$0xff] }
 0x2fc   :  { %1521 = vmatpush.bf16.msra.mxu0 %v2889_v57  ;;  %v1031_v57 = vperm.slane %v3226_v54, 0 }
 0x2ff   :  { %1643 = vmatpush.bf16.msrb.mxu1 %v3076_v37  ;;  %v2376_v37 = vld [vmem:[#allocation14 + $0x60] sm:$0xff] }
 0x300   :  { %1401 = vmatpush.bf16.msrb.mxu2 %v2376_v37  ;;  %1522 = vmatpush.bf16.msra.mxu0 %v2901_v60  ;;  %v1032_v60 = vperm.slane %v3226_v54, 1  ;;  %v3465_v37 = vld [vmem:[#allocation33_spill] sm:$0xff] }
 0x303   :  { %1644 = vmatpush.bf16.msrb.mxu1 %v3079_v31  ;;  %v2372_v31 = vld [vmem:[#allocation14 + $0x40] sm:$0xff] }
 0x304   :  { %1402 = vmatpush.bf16.msrb.mxu2 %v2375_v13  ;;  %1523 = vmatpush.bf16.msra.mxu0 %v2913_v63  ;;  %v3467_v13 = vld [vmem:[#allocation34_spill] sm:$0xff] }
 0x307   :  { %1645 = vmatpush.bf16.msrb.mxu1 %v3082_v40 }
 0x308   :  { %1403 = vmatpush.bf16.msrb.mxu2 %v2374_v39  ;;  %1524 = vmatpush.bf16.msra.mxu0 %v2966_v24  ;;  %v3468_v39 = vld [vmem:[#allocation63_spill] sm:$0xff] }
 0x30b   :  { %1646 = vmatpush.bf16.msrb.mxu1 %v3085_v48 }
 0x30c   :  { %1404 = vmatpush.bf16.msrb.mxu2 %v2373_v44  ;;  %1525 = vmatpush.bf16.msra.mxu0 %v2975_v29  ;;  %v3469_v44 = vld [vmem:[#allocation35_spill] sm:$0xff] }
 0x310   :  { %1405 = vmatpush.bf16.msrb.mxu2 %v2372_v31  ;;  %1526 = vmatpush.bf16.msra.mxu0 %v2984_v34  ;;  %v3470_v31 = vld [vmem:[#allocation64_spill] sm:$0xff] }
 0x314   :  { %1532 = vmatpush.bf16.msra.mxu2 %v2867_v49 }
 0x318   :  { %1533 = vmatpush.bf16.msra.mxu2 %v2883_v55 }
 0x31c   :  { %1534 = vmatpush.bf16.msra.mxu2 %v2895_v58 }
 0x320   :  { %1535 = vmatpush.bf16.msra.mxu2 %v2907_v61 }
 0x324   :  { %1536 = vmatpush.bf16.msra.mxu2 %v2919_v0 }
 0x328   :  { %1537 = vmatpush.bf16.msra.mxu2 %v2927_v1 }
 0x32c   :  { %1538 = vmatpush.bf16.msra.mxu2 %v2933_v2  ;;  %v1162_v2 = vld [vmem:[%s3344_s5 + $0x8] sm:$0xff] }
 0x330   :  { %1539 = vmatpush.bf16.msra.mxu2 %v2939_v5  ;;  %v1161_v5 = vld [vmem:[%s3344_s5] sm:$0xff] }
 0x341   :  { %v1083_v40 = vpop.f32.mrf.mxu1 }
 0x342   :  { %v1084_v58 = vadd.f32 %v1083_v40, %v1032_v60  ;;  %v3471_v40 = vld [vmem:[#allocation36_spill] sm:$0xff] }
 0x347   :  { %v1044_v48 = vpop.f32.mrf.mxu3 }
 0x348   :  { %v1045_v55 = vadd.f32 %v1044_v48, %v1031_v57  ;;  %v3472_v48 = vld [vmem:[#allocation37_spill] sm:$0xff] }
 0x349   :  { %v1085_v51 = vpop.f32.mrf.mxu1 }
 0x34a   :  { %v1058_v63 = vadd.f32 %v3194_v15, %v1045_v55  ;;  %v3473_v51 = vld [vmem:[#allocation38_spill] sm:$0xff]  ;;  %v3475_v55 = vld [vmem:[#allocation41_spill] sm:$0xff] }
 0x34c   :  { %v1071_v29 = vadd.f32 %v3049_v26, %v1058_v63  ;;  %v3446_v26 = vld [vmem:[#allocation28_spill] sm:$0xff] }
 0x34e   :  { %v1113_v9 = vmax.f32 %v1071_v29, 0.0 }
 0x34f   :  { %v1046_v49 = vpop.f32.mrf.mxu3 }
 0x350   :  { %v3474_v49 = vld [vmem:[#allocation39_spill] sm:$0xff] }
 0x357   :  { %v1096_v24 = vpop.f32.mrf.mxu3 }
 0x358   :  { %v1097_v61 = vadd.f32 %v1096_v24, %v1084_v58 }
 0x35a   :  { %v1110_v52 = vadd.f32 %v3198_v36, %v1097_v61  ;;  %v3456_v36 = vld [vmem:[#allocation31_spill] sm:$0xff] }
 0x35c   :  { %v1114_v18 = vmax.f32 %v1110_v52, 0.0 }
 0x35e   :  { %v1115_v34 = vpack.c.bf16 %v1114_v18, %v1113_v9 }
 0x35f   :  { %v1098_v27 = vpop.f32.mrf.mxu3 }
 0x360   :  { %v1283_v0 = vunpack.c.l.b16 %v1115_v34  ;;  %v1284_v46 = vunpack.c.h.b16 %v1115_v34 }
 0x362   :  { %v3245_v47 = vpack.c.b16 %v1283_v0, %v1283_v0  ;;  %v3247_v15 = vpack.c.b16 %v1284_v46, %v1284_v46 }
 0x364   :  { %1393 = vmatmul.bf16.vlgmr.msrb.gmra.mxu0 %v3245_v47  ;;  %1406 = vmatmul.bf16.vlgmr.msrb.gmra.mxu2 %v3247_v15 }
 0x365   :  { %1514 = vmatmul.bf16.vlgmr.msra.gmra.mxu1 %v3245_v47  ;;  %1652 = vmatpush.bf16.msrb.mxu2 %v2943_v7 }
 0x366   :  { %1691 = vmatpush.bf16.msra.mxu1 %v3089_v22  ;;  %1626 = vmatpush.bf16.msrb.mxu0 %v3108_v12  ;;  %v2712_v12 = vmov 0  }
 0x367   :  { %2404 = vset.pattern.permute.xlu0 %v2712_v12 }
 0x369   :  { %1653 = vmatpush.bf16.msrb.mxu2 %v2951_v11 }
 0x36a   :  { %1692 = vmatpush.bf16.msra.mxu1 %v3093_v38  ;;  %1627 = vmatpush.bf16.msrb.mxu0 %v3111_v21  ;;  %v1225_v38 = vld [vmem:[#allocation7] sm:$0xff]  ;;  %v3449_v21 = vld [vmem:[#allocation43_spill] sm:$0xff] }
 0x36b   :  { %v1220_v1 = vpop.f32.mrf.mxu1 }
 0x36c   :  { %v1221_v22 = vadd.f32 %v1220_v1, %v1161_v5 }
 0x36d   :  { %1654 = vmatpush.bf16.msrb.mxu2 %v2955_v14  ;;  %v2387_v14 = vld [vmem:[#allocation16 + $0x38] sm:$0xff] }
 0x36e   :  { %1693 = vmatpush.bf16.msra.mxu1 %v3096_v42  ;;  %1628 = vmatpush.bf16.msrb.mxu0 %v3122_v4  ;;  %v1497_v42 = vld [vmem:[%s3448_s16] sm:$0xff] }
 0x36f   :  { %vm1498_vm7 = vcmp.gt.f32.partialorder %v1497_v42, 0.5 }
 0x370   :  { %v1499_v4 = vsel %vm1498_vm7, 1, %v2712_v12  ;;  %v2419_v12 = vld [vmem:[#allocation5] sm:$0xff] }
 0x371   :  { %1655 = vmatpush.bf16.msrb.mxu2 %v2958_v17  ;;  %v3447_v17 = vld [vmem:[#allocation42_spill] sm:$0xff]  ;;  %1501 = vperm.xlu0 %2404, %v1499_v4  }
 0x372   :  { %1694 = vmatpush.bf16.msra.mxu1 %v3100_v45  ;;  %1629 = vmatpush.bf16.msrb.mxu0 %v3132_v25  ;;  %v2386_v45 = vld [vmem:[#allocation16 + $0x30] sm:$0xff] }
 0x373   :  { %v1222_v7 = vpop.f32.mrf.mxu1  ;;  %v3450_v25 = vld [vmem:[#allocation29_spill] sm:$0xff] }
 0x374   :  { %v1223_v11 = vadd.f32 %v1222_v7, %v1162_v2  ;;  %1527 = vmatmul.bf16.vlgmr.msra.gmra.mxu0 %v3247_v15 }
 0x375   :  { %1647 = vmatmul.bf16.vlgmr.msrb.gmra.mxu1 %v3245_v47  ;;  %1656 = vmatpush.bf16.msrb.mxu2 %v3446_v26  ;;  %v2406_v26 = vld [vmem:[%s3358_s19] ss:$0 sm:$0xff]  ;;  %s2713_s19 = smov [#allocation19]  }
 0x376   :  { %1244 = vmatpush.msrb.mxu3 %v1223_v11  ;;  %1695 = vmatpush.bf16.msra.mxu1 %v3447_v17  ;;  %s1722_s7 = sshll.u32 %s2713_s19, 4  ;;  %s1723_s7 = int_to_ptr.vmem [resolvable:$true] %s1722_s7 }
 0x377   :  { %1630 = vmatpush.bf16.msrb.mxu0 %v3139_v16  ;;  %v2385_v16 = vld [vmem:[#allocation16 + $0x28] sm:$0xff] }
 0x378   :  { %1245 = vmatpush.msrb.mxu3 %v1221_v22 }
 0x379   :  { %2161 = vmatmul.msk.f32.vlgmr.msrb.gmra.mxu3 %vm1226_vm6, %v1225_v38  ;;  %1657 = vmatpush.bf16.msrb.mxu2 %v3450_v25 }
 0x37a   :  { %1475 = vmatpush.bf16.msra.mxu3 %v2387_v14  ;;  %1696 = vmatpush.bf16.msra.mxu1 %v3449_v21 }
 0x37b   :  { %1631 = vmatpush.bf16.msrb.mxu0 %v3451_v10 }
 0x37d   :  { %1658 = vmatpush.bf16.msrb.mxu2 %v3453_v41 }
 0x37e   :  { %1476 = vmatpush.bf16.msra.mxu3 %v2386_v45  ;;  %1697 = vmatpush.bf16.msra.mxu1 %v3452_v20  ;;  %v3476_v20 = vld [vmem:[#allocation40_spill] sm:$0xff] }
 0x37f   :  { %1632 = vmatpush.bf16.msrb.mxu0 %v3454_v6 }
 0x381   :  { %1659 = vmatpush.bf16.msrb.mxu2 %v3456_v36  ;;  %v3477_v36 = vld [vmem:[#allocation44_spill] sm:$0xff] }
 0x382   :  { %1477 = vmatpush.bf16.msra.mxu3 %v2385_v16  ;;  %1698 = vmatpush.bf16.msra.mxu1 %v3455_v43 }
 0x383   :  { %1633 = vmatpush.bf16.msrb.mxu0 %v3457_v35 }
 0x385   :  { %1699 = vmatmul.bf16.vlgmr.msra.gmra.mxu1 %v3247_v15 }
 0x386   :  { %1478 = vmatpush.bf16.msra.mxu3 %v2384_v30 }
 0x387   :  { %1678 = vmatpush.bf16.msra.mxu0 %v3458_v50  ;;  %v3479_v50 = vld [vmem:[#allocation48_spill] sm:$0xff] }
 0x38a   :  { %1479 = vmatpush.bf16.msra.mxu3 %v2383_v19  ;;  %v3478_v19 = vld [vmem:[#allocation46_spill] sm:$0xff] }
 0x38b   :  { %1679 = vmatpush.bf16.msra.mxu0 %v3459_v32  ;;  %v3481_v32 = vld [vmem:[#allocation53_spill] sm:$0xff] }
 0x38e   :  { %1480 = vmatpush.bf16.msra.mxu3 %v2382_v53 }
 0x38f   :  { %1680 = vmatpush.bf16.msra.mxu0 %v3460_v59  ;;  %v3483_v59 = vld [vmem:[#allocation57_spill] sm:$0xff] }
 0x392   :  { %1481 = vmatpush.bf16.msra.mxu3 %v2381_v56  ;;  %v3482_v56 = vld [vmem:[#allocation55_spill] sm:$0xff] }
 0x393   :  { %1681 = vmatpush.bf16.msra.mxu0 %v3461_v23 }
 0x396   :  { %1482 = vmatpush.bf16.msra.mxu3 %v2380_v62  ;;  %v3484_v62 = vld [vmem:[#allocation59_spill] sm:$0xff] }
 0x397   :  { %1682 = vmatpush.bf16.msra.mxu0 %v3463_v33 }
 0x399   :  { %1483 = vmatmul.bf16.vlgmr.msra.gmra.mxu3 %v3464_v8 }
 0x39a   :  { %1550 = vmatpush.bf16.msrb.mxu3 %v3462_v28 }
 0x39b   :  { %1683 = vmatpush.bf16.msra.mxu0 %v3466_v3 }
 0x39e   :  { %1551 = vmatpush.bf16.msrb.mxu3 %v3465_v37 }
 0x39f   :  { %1684 = vmatpush.bf16.msra.mxu0 %v3468_v39 }
 0x3a2   :  { %1552 = vmatpush.bf16.msrb.mxu3 %v3467_v13 }
 0x3a3   :  { %1685 = vmatpush.bf16.msra.mxu0 %v3470_v31 }
 0x3a6   :  { %1553 = vmatpush.bf16.msrb.mxu3 %v3469_v44 }
 0x3aa   :  { %1554 = vmatpush.bf16.msrb.mxu3 %v3471_v40 }
 0x3ae   :  { %1555 = vmatpush.bf16.msrb.mxu3 %v3472_v48 }
 0x3b2   :  { %1556 = vmatpush.bf16.msrb.mxu3 %v3473_v51 }
 0x3b6   :  { %1557 = vmatpush.bf16.msrb.mxu3 %v3474_v49 }
 0x3ba   :  { %1613 = vmatpush.msra.mxu3 %v3475_v55 }
 0x3e1   :  { %v1394_v63 = vpop.f32.mrf.mxu0 }
 0x3e2   :  { %v1515_v58 = vpop.f32.mrf.mxu1 }
 0x3e3   :  { %v1502_v17 = vpop.permute.xlu0 %1501 }
 0x3e4   :  { %vm1503_vm8 = vcmp.eq.s32.totalorder %v1502_v17, 1 }
 0x3e7   :  { %v1407_v24 = vpop.f32.mrf.mxu2 }
 0x3e8   :  { %v1408_v5 = vadd.f32 %v1407_v24, %v1394_v63 }
 0x3e9   :  { %v1396_v29 = vpop.f32.mrf.mxu0 }
 0x3ea   :  { %v1517_v61 = vpop.f32.mrf.mxu1  ;;  %v1488_v7 = vperm.slane %v1408_v5, 0 }
 0x3ef   :  { %v1409_v52 = vpop.f32.mrf.mxu2 }
 0x3f1   :  { %v1528_v9 = vpop.f32.mrf.mxu0 }
 0x3f2   :  { %v1529_v18 = vadd.f32 %v1528_v9, %v1515_v58  ;;  %v3306_v34 = vpop.f32.mrf.mxu1 }
 0x3f4   :  { %v1545_v25 = vperm.slane %v1529_v18, 0 }
 0x3f9   :  { %v1530_v27 = vpop.f32.mrf.mxu0 }
 0x3fa   :  { %v1650_v0 = vpop.f32.mrf.mxu1 }
 0x3fc   :  { %v1247_v2 = vpop.f32.mrf.mxu3 }
 0x402   :  { %v3308_v46 = vpop.f32.mrf.mxu1 }
 0x40a   :  { %v1702_v1 = vpop.f32.mrf.mxu1 }
 0x41c   :  { %v1484_v11 = vpop.f32.mrf.mxu3 }
 0x41d   :  { %v1489_v14 = vadd.f32 %v1488_v7, %v1484_v11 }
 0x41f   :  { %v1490_v22 = vadd.f32 %v1489_v14, %v1247_v2 }
 0x421   :  { %v1495_v38 = vadd.f32 %v2406_v26, %v1490_v22 }
 0x423   :  { %v1496_v42 = vmax.f32 %v1495_v38, 0.0 }
 0x424   :  { %v1486_v45 = vpop.f32.mrf.mxu3 }
 0x425   :  { %v1504_v21 = vsel %vm1503_vm8, %v1496_v42, %v2419_v12 }
 0x426   :  { %v1505_v4 = vpack.c.bf16 %v1504_v21, %v1504_v21 }
 0x428   :  { %1540 = vmatmul.bf16.vlgmr.msra.gmra.mxu2 %v1505_v4 }
 0x438   :  { %1660 = vmatmul.bf16.vlgmr.msrb.gmra.mxu2 %v3247_v15  ;;  %v3480_v15 = vld [vmem:[#allocation49_spill] sm:$0xff] }
 0x4ab   :  { %v1541_v10 = vpop.f32.mrf.mxu2 }
 0x4ac   :  { %v1546_v16 = vadd.f32 %v1545_v25, %v1541_v10 }
 0x4ae   :  { %v1547_v41 = vadd.f32 %v3476_v20, %v1546_v16 }
 0x4b0   :  { %2413 = vtanh.f32 %v1547_v41 }
 0x4b3   :  { %v1543_v6 = vpop.f32.mrf.mxu2 }
 0x4b6   :  { %v2414_v30 = vpop.eup %2413 }
 0x4b7   :  { %v1549_v43 = vpack.c.bf16 %v2414_v30, %v2414_v30 }
 0x4b9   :  { %1558 = vmatmul.bf16.vlgmr.msrb.gmra.mxu3 %v1549_v43 }
 0x4ba   :  { %1665 = vmatpush.bf16.msrb.mxu3 %v3477_v36 }
 0x4bb   :  { %v3316_v35 = vpop.f32.mrf.mxu2 }
 0x4be   :  { %1666 = vmatpush.bf16.msrb.mxu3 %v3478_v19 }
 0x4c2   :  { %1667 = vmatpush.bf16.msrb.mxu3 %v3479_v50  ;;  %v1712_v50 = vlaneseq }
 0x4c3   :  { %v1663_v53 = vpop.f32.mrf.mxu2 }
 0x4c4   :  { %vm1714_vm14 = vcmp.lt.s32.totalorder %v1712_v50, 256 }
 0x4c6   :  { %1668 = vmatpush.bf16.msrb.mxu3 %v3480_v15 }
 0x4ca   :  { %1669 = vmatpush.bf16.msrb.mxu3 %v3481_v32 }
 0x4ce   :  { %1670 = vmatpush.bf16.msrb.mxu3 %v3482_v56 }
 0x4d2   :  { %1671 = vmatpush.bf16.msrb.mxu3 %v3483_v59 }
 0x4d6   :  { %1672 = vmatpush.bf16.msrb.mxu3 %v3484_v62 }
 0x53c   :  { %v1559_v23 = vpop.f32.mrf.mxu3 }
 0x53d   :  { %v1563_v28 = vsel %vm676_vm0, %v1559_v23, -inf }
 0x53e   :  { %v1564_v33 = vrot.slane %v1563_v28, 4 }
 0x540   :  { %v1565_v8 = vmax.f32 %v1563_v28, %v1564_v33 }
 0x542   :  { %v1566_v37 = vrot.slane %v1565_v8, 2 }
 0x544   :  { %v1567_v3 = vmax.f32 %v1565_v8, %v1566_v37  ;;  %v1561_v13 = vpop.f32.mrf.mxu3 }
 0x546   :  { %v1568_v39 = vrot.slane %v1567_v3, 1 }
 0x548   :  { %v1569_v44 = vmax.f32 %v1567_v3, %v1568_v39 }
 0x54a   :  { %v1570_v31 = vsub.f32 %v1559_v23, %v1569_v44 }
 0x54c   :  { %v1571_v40 = vmul.f32 1.442695, %v1570_v31 }
 0x54e   :  { %2415 = vpow2.f32 %v1571_v40 }
 0x554   :  { %v2416_v48 = vpop.eup %2415 }
 0x555   :  { %v1573_v51 = vsel %vm676_vm0, %v2416_v48, 0.0 }
 0x556   :  { %v1574_v49 = vrot.slane %v1573_v51, 4 }
 0x558   :  { %v1575_v55 = vadd.f32 %v1574_v49, %v1573_v51 }
 0x55a   :  { %v1576_v63 = vrot.slane %v1575_v55, 2 }
 0x55c   :  { %v1577_v58 = vadd.f32 %v1576_v63, %v1575_v55 }
 0x55e   :  { %v1578_v24 = vrot.slane %v1577_v58, 1 }
 0x560   :  { %v1579_v29 = vadd.f32 %v1578_v24, %v1577_v58 }
 0x562   :  { %2417 = vrcp.f32 %v1579_v29  ;;  %v1591_v18 = vand.u32 2147483648, %v1579_v29  ;;  %v1589_v0 = vand.u32 2147483647, %v1579_v29  ;;  %vm1585_vm10 = vweird.f32 %v1579_v29 }
 0x564   :  { %v1592_v2 = vor.u32 1.1754944e-38, %v1591_v18  ;;  %vm1590_vm12 = vcmp.eq.f32.partialorder %v1589_v0, 8.507059e+37 }
 0x568   :  { %v2418_v61 = vpop.eup %2417 }
 0x569   :  { %v1581_v52 = vmul.f32 %v2418_v61, %v1579_v29  ;;  %vm1586_vm9 = vweird.f32 %v2418_v61 }
 0x56a   :  { %vm1587_vm11 = vmor %vm1585_vm10, %vm1586_vm9 }
 0x56b   :  { %v1582_v9 = vsub.f32 1.0, %v1581_v52 }
 0x56d   :  { %v1583_v27 = vmul.f32 %v2418_v61, %v1582_v9 }
 0x56f   :  { %v1584_v1 = vadd.f32 %v2418_v61, %v1583_v27 }
 0x571   :  { %v1588_v5 = vsel %vm1587_vm11, %v2418_v61, %v1584_v1 }
 0x572   :  { %v1593_v7 = vsel %vm1590_vm12, %v1592_v2, %v1588_v5 }
 0x573   :  { %v1594_v11 = vmul.f32 %v2416_v48, %v1593_v7 }
 0x575   :  { %2258 = vmatmul.msk.f32.vlgmr.msra.gmra.mxu3 %vm676_vm0, %v1594_v11 }
 0x5f8   :  { %v1615_v14 = vpop.f32.mrf.mxu3 }
 0x5f9   :  { %v1618_v26 = vmul.f32 %v1615_v14, %v1504_v21 }
 0x5fb   :  { %v1619_v22 = vrot.slane %v1618_v26, 4 }
 0x5fd   :  { %v1620_v17 = vadd.f32 %v1619_v22, %v1618_v26 }
 0x5ff   :  { %v1621_v38 = vrot.slane %v1620_v17, 2 }
 0x601   :  { %v1622_v42 = vadd.f32 %v1621_v38, %v1620_v17 }
 0x603   :  { %v1623_v45 = vrot.slane %v1622_v42, 1 }
 0x605   :  { %v1624_v12 = vadd.f32 %v1623_v45, %v1622_v42 }
 0x607   :  { %v1625_v4 = vpack.c.bf16 %v1624_v12, %v1624_v12 }
 0x609   :  { %1634 = vmatmul.bf16.vlgmr.msrb.gmra.mxu0 %v1625_v4  ;;  %1673 = vmatmul.bf16.vlgmr.msrb.gmra.mxu3 %v1625_v4 }
 0x619   :  { %1686 = vmatmul.bf16.vlgmr.msra.gmra.mxu0 %v3245_v47 }
 0x686   :  { %v1635_v25 = vpop.f32.mrf.mxu0 }
 0x687   :  { %v1636_v20 = vadd.f32 %v1635_v25, %v1031_v57 }
 0x689   :  { %v1649_v21 = vadd.f32 %v3306_v34, %v1636_v20 }
 0x68b   :  { %v1662_v36 = vadd.f32 %v3316_v35, %v1649_v21 }
 0x68c   :  { %v1674_v10 = vpop.f32.mrf.mxu3 }
 0x68d   :  { %v1675_v6 = vadd.f32 %v1674_v10, %v1032_v60  ;;  %v1704_v57 = vmax.f32 %v1662_v36, 0.0 }
 0x68e   :  { %v1637_v16 = vpop.f32.mrf.mxu0 }
 0x694   :  { %v1676_v41 = vpop.f32.mrf.mxu3 }
 0x696   :  { %v1687_v30 = vpop.f32.mrf.mxu0 }
 0x697   :  { %v1688_v43 = vadd.f32 %v1687_v30, %v1675_v6 }
 0x699   :  { %v1701_v19 = vadd.f32 %v3308_v46, %v1688_v43 }
 0x69b   :  { %v1705_v47 = vmax.f32 %v1701_v19, 0.0 }
 0x69d   :  { %v1708_v34 = vrot.slane %v1705_v47, 7 }
 0x69e   :  { %v1689_v54 = vpop.f32.mrf.mxu0 }
 0x69f   :  { %v1710_v60 = vsel %vm1709_vm13, %v1704_v57, %v1708_v34 }
 0x6a0   :  { %1716 = vst.msk [vmem:[#allocation19] sm:$0x3] %vm1714_vm14, %v1710_v60 }
 0x6a1   :  { %1727 = dma.vmem_to_hbm [thread:$0]  %s1723_s7, 32, %s1725_s4, [#allocation4]  }
 0x6a2   :  { %2696 = dma.done.wait [#allocation4], 32  }
 0x6a3   :  { %2697 = vsyncadd [#allocation4], 4294967264 }
 0x6a4   :  { %1732 = vsyncpa [#allocation3], 1 }
 0x6a5   :  { %1733 = vsyncpa [#allocation6], 1 }
 0x6a6   :  { %1734 = vsyncpa [#allocation9], 1 }
 0x6a7   :  { %1735 = vsyncpa [#allocation12], 1 }
 0x6a8   :  { %1736 = vsyncpa [#allocation15], 1 }
 0x6a9   :  { %1737 = vsyncpa [#allocation18], 1 }
 0x6aa   :  { %1738 = vsyncpa [#allocation4], 1 }

</bundles_post_ra>
